<compile_context>
chip_gen: v7x
topology: tpu7x:2x2x1
jax: 0.10.0
libtpu: 0.0.40
codegen_flags: <defaults>
</compile_context>

<pallas_src>
import functools

import jax
import jax.numpy as jnp
from jax import lax
from jax.experimental import pallas as pl
from jax.experimental.pallas import tpu as pltpu


def _round_up(x, m):
    return -(-x // m) * m


# ----------------------------------------------------------------------------
# Fused Bottleneck kernel: one grid step == one batch element.
# ----------------------------------------------------------------------------
def _bottleneck_kernel(x_ref, w1_ref, s1_ref, t1_ref,
                       w2_ref, s2_ref, t2_ref,
                       w3_ref, s3_ref, t3_ref,
                       o_ref, pad_ref, *, H, W, width):
    HW = H * W
    Wk = w1_ref.shape[1]          # lane-padded stage-2 contraction width (3*width -> 128)
    f32 = jnp.float32

    # ---- stage 1: 1x1 conv + BN + ReLU --------------------------------------
    # w1 is replicated 3x along its output axis, so y1 already carries the
    # bottleneck channels on lane groups [0:w), [w:2w), [2w:3w) — the three kw
    # taps of the 3x3 conv packed along the MXU contraction dimension.
    x2d = jnp.transpose(x_ref[0])                              # (HW, Cin) f32
    y1 = jnp.dot(x2d.astype(jnp.bfloat16), w1_ref[...],
                 preferred_element_type=f32)                   # (HW, Wk)
    y1 = jnp.maximum(y1 * s1_ref[...] + t1_ref[...], 0.0)

    # ---- build the flat, contiguous, kw-packed padded buffer ---------------
    # pad_ref row r*W + c (r in [0,H+2), c in [0,W)) holds, per lane group,
    #   [0 : w)   = P[r, c]      (kw = 0 tap input)
    #   [w : 2w)  = P[r, c+1]    (kw = 1)
    #   [2w: 3w)  = P[r, c+2]    (kw = 2)
    # where P is the zero-padded stage-1 image.  Built as one bulk value store
    # plus two tiny halo-row zero stores (no full-buffer zero fill).
    lane = lax.broadcasted_iota(jnp.int32, (1, Wk), 1)
    sel_l = (lane < width).astype(f32)
    sel_m = ((lane >= width) & (lane < 2 * width)).astype(f32)
    sel_r = ((lane >= 2 * width) & (lane < 3 * width)).astype(f32)
    col = lax.broadcasted_iota(jnp.int32, (HW, 1), 0) % W
    lmask = (col != 0).astype(f32)          # zero left-edge padding column
    rmask = (col != W - 1).astype(f32)      # zero right-edge padding column

    zrow = jnp.zeros((1, Wk), f32)
    y_dn = jnp.concatenate([zrow, y1[:HW - 1, :]], axis=0)     # row q -> y1[q-1]
    y_up = jnp.concatenate([y1[1:, :], zrow], axis=0)          # row q -> y1[q+1]

    q_int = (y_dn * lmask * sel_l + y1 * sel_m + y_up * rmask * sel_r)
    q_int = q_int.astype(jnp.bfloat16)                         # (HW, Wk) bf16

    zhalo = jnp.zeros((W, Wk), jnp.bfloat16)
    pad_ref[pl.ds(0, W), :] = zhalo                            # top padding row
    pad_ref[pl.ds(W, HW), :] = q_int                           # interior, one bulk store
    pad_ref[pl.ds(W + HW, W), :] = zhalo                       # bottom padding row

    # ---- stage 2: 3x3 conv as 3 contiguous tap-group matmuls + BN + ReLU ----
    acc = None
    for kh in range(3):                                        # static unroll
        patch = pad_ref[pl.ds(kh * W, HW), :]                  # (HW, Wk) bf16, contiguous
        contrib = jnp.dot(patch, w2_ref[kh], preferred_element_type=f32)
        acc = contrib if acc is None else acc + contrib        # value accumulation
    y2 = jnp.maximum(acc * s2_ref[...] + t2_ref[...], 0.0)     # (HW, Wn)

    # ---- stage 3: 1x1 conv + BN + identity residual + ReLU ------------------
    y3 = jnp.dot(y2.astype(jnp.bfloat16), w3_ref[...],
                 preferred_element_type=f32)                   # (HW, Cout)
    y3 = y3 * s3_ref[...] + t3_ref[...]
    out_cm = jnp.transpose(y3) + x_ref[0]                      # residual, channel-major
    o_ref[0] = jnp.maximum(out_cm, 0.0).astype(o_ref.dtype)


# ----------------------------------------------------------------------------
# Wrapper
# ----------------------------------------------------------------------------
def _fold_bn(bn_params, eps=1e-5):
    gamma, beta, mean, var = bn_params
    scale = gamma / jnp.sqrt(var + eps)
    shift = beta - mean * scale
    return scale.astype(jnp.float32), shift.astype(jnp.float32)


def _pad_cols(a, size):
    pad = size - a.shape[-1]
    if pad == 0:
        return a
    return jnp.pad(a, [(0, 0)] * (a.ndim - 1) + [(0, pad)])


def _pad_row(v, size):
    return _pad_cols(v.reshape(1, -1), size)


def bottleneck_forward(x_nchw, params, eps=1e-5):
    w1, bn1, w2, bn2, w3, bn3 = params
    N, Cin, H, W = x_nchw.shape
    width = w1.shape[0]
    cout = w3.shape[0]
    HW = H * W
    assert cout == Cin, "downsample=None requires inplanes == planes*expansion"
    assert Cin % 128 == 0 and cout % 128 == 0
    assert W % 8 == 0 and HW % 8 == 0
    assert 3 * width <= 128, "kw-packed layout assumes 3*width fits one 128-lane tile"

    Wk = 128                        # stage-2 contraction lanes (3*width packed, zero padded)
    Wn = _round_up(width, 128)      # stage-2 output lanes

    s1, t1 = _fold_bn(bn1, eps)
    s2, t2 = _fold_bn(bn2, eps)
    s3, t3 = _fold_bn(bn3, eps)

    # Stage-1 weight / BN replicated 3x along the output so the kernel's y1
    # already carries the kw=0/1/2 copies on separate lane groups.
    w1_2d = jnp.transpose(w1[:, :, 0, 0])                                    # (Cin, width)
    w1_rep = _pad_cols(jnp.concatenate([w1_2d] * 3, axis=1), Wk).astype(jnp.bfloat16)
    s1_rep = _pad_row(jnp.concatenate([s1] * 3), Wk)
    t1_rep = _pad_row(jnp.concatenate([t1] * 3), Wk)

    # Stage-2 weights: for each kh, stack the 3 kw taps along the contraction dim.
    w2_t = jnp.transpose(w2, (2, 3, 1, 0))                                   # (kh, kw, in, out)
    w2g = jnp.stack([jnp.concatenate([w2_t[kh, 0], w2_t[kh, 1], w2_t[kh, 2]], axis=0)
                     for kh in range(3)])                                    # (3, 3*width, width)
    w2g = jnp.pad(w2g, ((0, 0), (0, Wk - 3 * width), (0, Wn - width))).astype(jnp.bfloat16)
    s2_p, t2_p = _pad_row(s2, Wn), _pad_row(t2, Wn)

    w3_p = jnp.pad(jnp.transpose(w3[:, :, 0, 0]),
                   ((0, Wn - width), (0, 0))).astype(jnp.bfloat16)           # (Wn, Cout)
    s3_p, t3_p = s3.reshape(1, -1), t3.reshape(1, -1)

    # Free metadata reshape: keep NCHW in HBM, kernel transposes in VMEM.
    x_cm = x_nchw.reshape(N, Cin, HW)

    kernel = functools.partial(_bottleneck_kernel, H=H, W=W, width=width)

    # Advisory cost estimate with the real (unpadded) conv arithmetic.
    flops = 2 * N * HW * (Cin * width + 9 * width * width + width * cout)
    bytes_accessed = (N * Cin * HW * 4 + N * cout * HW * 4
                      + (w1_rep.size + w2g.size + w3_p.size) * 2
                      + (s1_rep.size + t1_rep.size + s2_p.size + t2_p.size
                         + s3_p.size + t3_p.size) * 4)

    out = pl.pallas_call(
        kernel,
        out_shape=jax.ShapeDtypeStruct((N, cout, HW), jnp.float32),
        grid=(N,),
        in_specs=[
            pl.BlockSpec((1, Cin, HW), lambda n: (n, 0, 0)),
            pl.BlockSpec((Cin, Wk), lambda n: (0, 0)),
            pl.BlockSpec((1, Wk), lambda n: (0, 0)),
            pl.BlockSpec((1, Wk), lambda n: (0, 0)),
            pl.BlockSpec((3, Wk, Wn), lambda n: (0, 0, 0)),
            pl.BlockSpec((1, Wn), lambda n: (0, 0)),
            pl.BlockSpec((1, Wn), lambda n: (0, 0)),
            pl.BlockSpec((Wn, cout), lambda n: (0, 0)),
            pl.BlockSpec((1, cout), lambda n: (0, 0)),
            pl.BlockSpec((1, cout), lambda n: (0, 0)),
        ],
        out_specs=pl.BlockSpec((1, cout, HW), lambda n: (n, 0, 0)),
        scratch_shapes=[
            pltpu.VMEM(((H + 2) * W, Wk), jnp.bfloat16),   # kw-packed padded stage-1 activations
        ],
        compiler_params=pltpu.CompilerParams(dimension_semantics=("parallel",)),
        cost_estimate=pl.CostEstimate(flops=flops, transcendentals=0,
                                      bytes_accessed=bytes_accessed),
    )(x_cm, w1_rep, s1_rep, t1_rep, w2g, s2_p, t2_p, w3_p, s3_p, t3_p)

    return out.reshape(N, cout, H, W)


# ----------------------------------------------------------------------------
# Pure-JAX reference (mirrors the PyTorch module in eval mode, f32 precision)
# ----------------------------------------------------------------------------
def bottleneck_ref(x, params, eps=1e-5):
    def bn(y, p):
        g, b, m, v = p
        return ((y - m[None, :, None, None]) / jnp.sqrt(v[None, :, None, None] + eps)
                * g[None, :, None, None] + b[None, :, None, None])

    w1, bn1, w2, bn2, w3, bn3 = params
    dn = ("NCHW", "OIHW", "NCHW")
    hi = lax.Precision.HIGHEST
    out = lax.conv_general_dilated(x, w1, (1, 1), "VALID", dimension_numbers=dn,
                                   precision=hi)
    out = jax.nn.relu(bn(out, bn1))
    out = lax.conv_general_dilated(out, w2, (1, 1), ((1, 1), (1, 1)),
                                   dimension_numbers=dn, precision=hi)
    out = jax.nn.relu(bn(out, bn2))
    out = lax.conv_general_dilated(out, w3, (1, 1), "VALID", dimension_numbers=dn,
                                   precision=hi)
    out = bn(out, bn3) + x
    return jax.nn.relu(out)


# ----------------------------------------------------------------------------
# Deterministic parameter construction + run
# ----------------------------------------------------------------------------
def make_params(key, inplanes, planes, expansion=4, base_width=64, groups=1):
    width = int(planes * (base_width / 64.0)) * groups
    cout = planes * expansion
    ks = jax.random.split(key, 15)

    def bn_params(k0, k1, k2, k3, c):
        gamma = jax.random.uniform(k0, (c,), jnp.float32, 0.5, 1.5)
        beta = 0.1 * jax.random.normal(k1, (c,), jnp.float32)
        mean = 0.1 * jax.random.normal(k2, (c,), jnp.float32)
        var = jax.random.uniform(k3, (c,), jnp.float32, 0.5, 1.5)
        return (gamma, beta, mean, var)

    w1 = 0.05 * jax.random.normal(ks[0], (width, inplanes, 1, 1), jnp.float32)
    w2 = 0.05 * jax.random.normal(ks[1], (width, width, 3, 3), jnp.float32)
    w3 = 0.05 * jax.random.normal(ks[2], (cout, width, 1, 1), jnp.float32)
    bn1 = bn_params(*ks[3:7], width)
    bn2 = bn_params(*ks[7:11], width)
    bn3 = bn_params(*ks[11:15], cout)
    return (w1, bn1, w2, bn2, w3, bn3)


if __name__ == "__main__":
    key = jax.random.PRNGKey(0)
    k_x, k_p = jax.random.split(key)

    N, inplanes, planes, H, W = 2, 128, 32, 16, 16   # inplanes == planes*4
    x = jax.random.normal(k_x, (N, inplanes, H, W), jnp.float32)
    params = make_params(k_p, inplanes, planes)

    fwd = jax.jit(bottleneck_forward)
    out = jax.block_until_ready(fwd(x, params))
    ref = jax.block_until_ready(bottleneck_ref(x, params))

    assert out.shape == ref.shape == (N, inplanes, H, W)
    # bf16 MXU inputs (f32 accumulation / BN / residual) vs. an f32 reference:
    # expected max error ~1e-3; tolerance set with margin.
    if not jnp.allclose(out, ref, atol=1e-2, rtol=1e-2):
        max_err = jnp.max(jnp.abs(out - ref))
        raise SystemExit(f"mismatch vs reference, max abs err = {max_err}")
    print("KERNEL_OK")
</pallas_src>

<mosaic_0001>
module attributes {stable_mosaic.version = 11 : i64} {
  func.func @_bottleneck_kernel(%arg0: i32, %arg1: memref<1x128x256xf32, #tpu.memory_space<vmem>>, %arg2: memref<128x128xbf16, #tpu.memory_space<vmem>>, %arg3: memref<1x128xf32, #tpu.memory_space<vmem>>, %arg4: memref<1x128xf32, #tpu.memory_space<vmem>>, %arg5: memref<3x128x128xbf16, #tpu.memory_space<vmem>>, %arg6: memref<1x128xf32, #tpu.memory_space<vmem>>, %arg7: memref<1x128xf32, #tpu.memory_space<vmem>>, %arg8: memref<128x128xbf16, #tpu.memory_space<vmem>>, %arg9: memref<1x128xf32, #tpu.memory_space<vmem>>, %arg10: memref<1x128xf32, #tpu.memory_space<vmem>>, %arg11: memref<1x128x256xf32, #tpu.memory_space<vmem>>, %arg12: memref<288x128xbf16, #tpu.memory_space<vmem>>) attributes {dimension_semantics = [#tpu.dimension_semantics<parallel>], iteration_bounds = array<i64: 2>, scalar_prefetch = 0 : i64, scratch_operands = 1 : i64, tpu.core_type = #tpu.core_type<tc>, window_params = [{transform_indices = @transform_0, window_bounds = array<i64: 1, 128, 256>}, {pipeline_mode = #tpu.pipeline_mode<synchronous>, transform_indices = @transform_1, window_bounds = array<i64: 128, 128>}, {pipeline_mode = #tpu.pipeline_mode<synchronous>, transform_indices = @transform_2, window_bounds = array<i64: 1, 128>}, {pipeline_mode = #tpu.pipeline_mode<synchronous>, transform_indices = @transform_3, window_bounds = array<i64: 1, 128>}, {pipeline_mode = #tpu.pipeline_mode<synchronous>, transform_indices = @transform_4, window_bounds = array<i64: 3, 128, 128>}, {pipeline_mode = #tpu.pipeline_mode<synchronous>, transform_indices = @transform_5, window_bounds = array<i64: 1, 128>}, {pipeline_mode = #tpu.pipeline_mode<synchronous>, transform_indices = @transform_6, window_bounds = array<i64: 1, 128>}, {pipeline_mode = #tpu.pipeline_mode<synchronous>, transform_indices = @transform_7, window_bounds = array<i64: 128, 128>}, {pipeline_mode = #tpu.pipeline_mode<synchronous>, transform_indices = @transform_8, window_bounds = array<i64: 1, 128>}, {pipeline_mode = #tpu.pipeline_mode<synchronous>, transform_indices = @transform_9, window_bounds = array<i64: 1, 128>}, {transform_indices = @transform_10, window_bounds = array<i64: 1, 128, 256>}]} {
    %c0 = arith.constant 0 : index
    %c0_0 = arith.constant 0 : index
    %c0_1 = arith.constant 0 : index
    %0 = vector.load %arg1[%c0, %c0_0, %c0_1] : memref<1x128x256xf32, #tpu.memory_space<vmem>>, vector<1x128x256xf32>
    %1 = vector.shape_cast %0 : vector<1x128x256xf32> to vector<128x256xf32>
    %2 = tpu.transpose %1, [1, 0] : vector<128x256xf32> -> vector<256x128xf32>
    %3 = arith.truncf %2 : vector<256x128xf32> to vector<256x128xbf16>
    %c0_2 = arith.constant 0 : index
    %c0_3 = arith.constant 0 : index
    %4 = vector.load %arg2[%c0_2, %c0_3] : memref<128x128xbf16, #tpu.memory_space<vmem>>, vector<128x128xbf16>
    %cst = arith.constant dense<0.000000e+00> : vector<256x128xf32>
    %5 = tpu.matmul %3, %4, %cst {dimension_numbers = #tpu.dot_dimension_numbers<[1], [0], [0], [1], [0, 0, 1, 1], [], []>} : vector<256x128xbf16>, vector<128x128xbf16>, vector<256x128xf32> -> vector<256x128xf32>
    %c0_4 = arith.constant 0 : index
    %c0_5 = arith.constant 0 : index
    %6 = vector.load %arg3[%c0_4, %c0_5] : memref<1x128xf32, #tpu.memory_space<vmem>>, vector<1x128xf32>
    %7 = vector.broadcast %6 : vector<1x128xf32> to vector<256x128xf32>
    %8 = arith.mulf %5, %7 : vector<256x128xf32>
    %c0_6 = arith.constant 0 : index
    %c0_7 = arith.constant 0 : index
    %9 = vector.load %arg4[%c0_6, %c0_7] : memref<1x128xf32, #tpu.memory_space<vmem>>, vector<1x128xf32>
    %10 = vector.broadcast %9 : vector<1x128xf32> to vector<256x128xf32>
    %11 = arith.addf %8, %10 : vector<256x128xf32>
    %cst_8 = arith.constant 0.000000e+00 : f32
    %12 = vector.broadcast %cst_8 : f32 to vector<256x128xf32>
    %13 = arith.maximumf %11, %12 : vector<256x128xf32>
    %14 = tpu.iota {dimensions = array<i32: 1>} : vector<1x128xi32>
    %c32_i32 = arith.constant 32 : i32
    %15 = vector.broadcast %c32_i32 : i32 to vector<1x128xi32>
    %16 = arith.cmpi slt, %14, %15 : vector<1x128xi32>
    %17 = arith.extui %16 : vector<1x128xi1> to vector<1x128xi32>
    %18 = arith.sitofp %17 : vector<1x128xi32> to vector<1x128xf32>
    %c32_i32_9 = arith.constant 32 : i32
    %19 = vector.broadcast %c32_i32_9 : i32 to vector<1x128xi32>
    %20 = arith.cmpi sge, %14, %19 : vector<1x128xi32>
    %c64_i32 = arith.constant 64 : i32
    %21 = vector.broadcast %c64_i32 : i32 to vector<1x128xi32>
    %22 = arith.cmpi slt, %14, %21 : vector<1x128xi32>
    %23 = arith.andi %20, %22 : vector<1x128xi1>
    %24 = arith.extui %23 : vector<1x128xi1> to vector<1x128xi32>
    %25 = arith.sitofp %24 : vector<1x128xi32> to vector<1x128xf32>
    %c64_i32_10 = arith.constant 64 : i32
    %26 = vector.broadcast %c64_i32_10 : i32 to vector<1x128xi32>
    %27 = arith.cmpi sge, %14, %26 : vector<1x128xi32>
    %c96_i32 = arith.constant 96 : i32
    %28 = vector.broadcast %c96_i32 : i32 to vector<1x128xi32>
    %29 = arith.cmpi slt, %14, %28 : vector<1x128xi32>
    %30 = arith.andi %27, %29 : vector<1x128xi1>
    %31 = arith.extui %30 : vector<1x128xi1> to vector<1x128xi32>
    %32 = arith.sitofp %31 : vector<1x128xi32> to vector<1x128xf32>
    %33 = tpu.iota {dimensions = array<i32: 0>} : vector<256x1xi32>
    %c16_i32 = arith.constant 16 : i32
    %c0_i32 = arith.constant 0 : i32
    %34 = arith.cmpi eq, %c16_i32, %c0_i32 : i32
    %c1_i32 = arith.constant 1 : i32
    %35 = arith.select %34, %c1_i32, %c16_i32 : i32
    %36 = vector.broadcast %35 : i32 to vector<256x1xi32>
    %37 = arith.remsi %33, %36 : vector<256x1xi32>
    %c0_i32_11 = arith.constant 0 : i32
    %38 = vector.broadcast %c0_i32_11 : i32 to vector<256x1xi32>
    %39 = arith.cmpi ne, %37, %38 : vector<256x1xi32>
    %c0_i32_12 = arith.constant 0 : i32
    %40 = vector.broadcast %c0_i32_12 : i32 to vector<256x1xi32>
    %41 = arith.cmpi slt, %37, %40 : vector<256x1xi32>
    %c0_i32_13 = arith.constant 0 : i32
    %42 = arith.cmpi slt, %35, %c0_i32_13 : i32
    %43 = vector.broadcast %42 : i1 to vector<256x1xi1>
    %44 = vector.broadcast %43 : vector<256x1xi1> to vector<256x1xi1>
    %45 = arith.xori %41, %44 : vector<256x1xi1>
    %46 = arith.andi %45, %39 : vector<256x1xi1>
    %47 = vector.broadcast %35 : i32 to vector<256x1xi32>
    %48 = arith.addi %37, %47 : vector<256x1xi32>
    %49 = arith.select %46, %48, %37 : vector<256x1xi1>, vector<256x1xi32>
    %c0_i32_14 = arith.constant 0 : i32
    %50 = vector.broadcast %c0_i32_14 : i32 to vector<256x1xi32>
    %51 = arith.cmpi ne, %49, %50 : vector<256x1xi32>
    %52 = arith.extui %51 : vector<256x1xi1> to vector<256x1xi32>
    %53 = arith.sitofp %52 : vector<256x1xi32> to vector<256x1xf32>
    %c15_i32 = arith.constant 15 : i32
    %54 = vector.broadcast %c15_i32 : i32 to vector<256x1xi32>
    %55 = arith.cmpi ne, %49, %54 : vector<256x1xi32>
    %56 = arith.extui %55 : vector<256x1xi1> to vector<256x1xi32>
    %57 = arith.sitofp %56 : vector<256x1xi32> to vector<256x1xf32>
    %cst_15 = arith.constant 0.000000e+00 : f32
    %58 = vector.broadcast %cst_15 : f32 to vector<1x128xf32>
    %59 = vector.extract_strided_slice %13 {offsets = [0, 0], sizes = [255, 128], strides = [1, 1]} : vector<256x128xf32> to vector<255x128xf32>
    %60 = tpu.concatenate %58, %59 in 0 : vector<1x128xf32>, vector<255x128xf32> -> vector<256x128xf32>
    %61 = vector.extract_strided_slice %13 {offsets = [1, 0], sizes = [255, 128], strides = [1, 1]} : vector<256x128xf32> to vector<255x128xf32>
    %62 = tpu.concatenate %61, %58 in 0 : vector<255x128xf32>, vector<1x128xf32> -> vector<256x128xf32>
    %63 = vector.broadcast %53 : vector<256x1xf32> to vector<256x128xf32>
    %64 = arith.mulf %60, %63 : vector<256x128xf32>
    %65 = vector.broadcast %18 : vector<1x128xf32> to vector<256x128xf32>
    %66 = arith.mulf %64, %65 : vector<256x128xf32>
    %67 = vector.broadcast %25 : vector<1x128xf32> to vector<256x128xf32>
    %68 = arith.mulf %13, %67 : vector<256x128xf32>
    %69 = arith.addf %66, %68 : vector<256x128xf32>
    %70 = vector.broadcast %57 : vector<256x1xf32> to vector<256x128xf32>
    %71 = arith.mulf %62, %70 : vector<256x128xf32>
    %72 = vector.broadcast %32 : vector<1x128xf32> to vector<256x128xf32>
    %73 = arith.mulf %71, %72 : vector<256x128xf32>
    %74 = arith.addf %69, %73 : vector<256x128xf32>
    %75 = arith.truncf %74 : vector<256x128xf32> to vector<256x128xbf16>
    %cst_16 = arith.constant 0.000000e+00 : bf16
    %76 = vector.broadcast %cst_16 : bf16 to vector<16x128xbf16>
    %c0_17 = arith.constant 0 : index
    %c0_18 = arith.constant 0 : index
    %77 = vector.load %arg12[%c0_17, %c0_18] : memref<288x128xbf16, #tpu.memory_space<vmem>>, vector<16x128xbf16>
    tpu.vector_store %arg12[%c0_17, %c0_18], %76 {strides = array<i32>} : memref<288x128xbf16, #tpu.memory_space<vmem>>, vector<16x128xbf16>,
    %c16 = arith.constant 16 : index
    %c0_19 = arith.constant 0 : index
    %78 = vector.load %arg12[%c16, %c0_19] : memref<288x128xbf16, #tpu.memory_space<vmem>>, vector<256x128xbf16>
    tpu.vector_store %arg12[%c16, %c0_19], %75 {strides = array<i32>} : memref<288x128xbf16, #tpu.memory_space<vmem>>, vector<256x128xbf16>,
    %c272 = arith.constant 272 : index
    %c0_20 = arith.constant 0 : index
    %79 = vector.load %arg12[%c272, %c0_20] : memref<288x128xbf16, #tpu.memory_space<vmem>>, vector<16x128xbf16>
    tpu.vector_store %arg12[%c272, %c0_20], %76 {strides = array<i32>} : memref<288x128xbf16, #tpu.memory_space<vmem>>, vector<16x128xbf16>,
    %c0_21 = arith.constant 0 : index
    %c0_22 = arith.constant 0 : index
    %80 = vector.load %arg12[%c0_21, %c0_22] : memref<288x128xbf16, #tpu.memory_space<vmem>>, vector<256x128xbf16>
    %c0_23 = arith.constant 0 : index
    %c0_24 = arith.constant 0 : index
    %c0_25 = arith.constant 0 : index
    %81 = vector.load %arg5[%c0_23, %c0_24, %c0_25] : memref<3x128x128xbf16, #tpu.memory_space<vmem>>, vector<1x128x128xbf16>
    %82 = vector.shape_cast %81 : vector<1x128x128xbf16> to vector<128x128xbf16>
    %cst_26 = arith.constant dense<0.000000e+00> : vector<256x128xf32>
    %83 = tpu.matmul %80, %82, %cst_26 {dimension_numbers = #tpu.dot_dimension_numbers<[1], [0], [0], [1], [0, 0, 1, 1], [], []>} : vector<256x128xbf16>, vector<128x128xbf16>, vector<256x128xf32> -> vector<256x128xf32>
    %c16_27 = arith.constant 16 : index
    %c0_28 = arith.constant 0 : index
    %84 = vector.load %arg12[%c16_27, %c0_28] : memref<288x128xbf16, #tpu.memory_space<vmem>>, vector<256x128xbf16>
    %c1 = arith.constant 1 : index
    %c0_29 = arith.constant 0 : index
    %c0_30 = arith.constant 0 : index
    %85 = vector.load %arg5[%c1, %c0_29, %c0_30] : memref<3x128x128xbf16, #tpu.memory_space<vmem>>, vector<1x128x128xbf16>
    %86 = vector.shape_cast %85 : vector<1x128x128xbf16> to vector<128x128xbf16>
    %cst_31 = arith.constant dense<0.000000e+00> : vector<256x128xf32>
    %87 = tpu.matmul %84, %86, %cst_31 {dimension_numbers = #tpu.dot_dimension_numbers<[1], [0], [0], [1], [0, 0, 1, 1], [], []>} : vector<256x128xbf16>, vector<128x128xbf16>, vector<256x128xf32> -> vector<256x128xf32>
    %88 = arith.addf %83, %87 : vector<256x128xf32>
    %c32 = arith.constant 32 : index
    %c0_32 = arith.constant 0 : index
    %89 = vector.load %arg12[%c32, %c0_32] : memref<288x128xbf16, #tpu.memory_space<vmem>>, vector<256x128xbf16>
    %c2 = arith.constant 2 : index
    %c0_33 = arith.constant 0 : index
    %c0_34 = arith.constant 0 : index
    %90 = vector.load %arg5[%c2, %c0_33, %c0_34] : memref<3x128x128xbf16, #tpu.memory_space<vmem>>, vector<1x128x128xbf16>
    %91 = vector.shape_cast %90 : vector<1x128x128xbf16> to vector<128x128xbf16>
    %cst_35 = arith.constant dense<0.000000e+00> : vector<256x128xf32>
    %92 = tpu.matmul %89, %91, %cst_35 {dimension_numbers = #tpu.dot_dimension_numbers<[1], [0], [0], [1], [0, 0, 1, 1], [], []>} : vector<256x128xbf16>, vector<128x128xbf16>, vector<256x128xf32> -> vector<256x128xf32>
    %93 = arith.addf %88, %92 : vector<256x128xf32>
    %c0_36 = arith.constant 0 : index
    %c0_37 = arith.constant 0 : index
    %94 = vector.load %arg6[%c0_36, %c0_37] : memref<1x128xf32, #tpu.memory_space<vmem>>, vector<1x128xf32>
    %95 = vector.broadcast %94 : vector<1x128xf32> to vector<256x128xf32>
    %96 = arith.mulf %93, %95 : vector<256x128xf32>
    %c0_38 = arith.constant 0 : index
    %c0_39 = arith.constant 0 : index
    %97 = vector.load %arg7[%c0_38, %c0_39] : memref<1x128xf32, #tpu.memory_space<vmem>>, vector<1x128xf32>
    %98 = vector.broadcast %97 : vector<1x128xf32> to vector<256x128xf32>
    %99 = arith.addf %96, %98 : vector<256x128xf32>
    %cst_40 = arith.constant 0.000000e+00 : f32
    %100 = vector.broadcast %cst_40 : f32 to vector<256x128xf32>
    %101 = arith.maximumf %99, %100 : vector<256x128xf32>
    %102 = arith.truncf %101 : vector<256x128xf32> to vector<256x128xbf16>
    %c0_41 = arith.constant 0 : index
    %c0_42 = arith.constant 0 : index
    %103 = vector.load %arg8[%c0_41, %c0_42] : memref<128x128xbf16, #tpu.memory_space<vmem>>, vector<128x128xbf16>
    %cst_43 = arith.constant dense<0.000000e+00> : vector<256x128xf32>
    %104 = tpu.matmul %102, %103, %cst_43 {dimension_numbers = #tpu.dot_dimension_numbers<[1], [0], [0], [1], [0, 0, 1, 1], [], []>} : vector<256x128xbf16>, vector<128x128xbf16>, vector<256x128xf32> -> vector<256x128xf32>
    %c0_44 = arith.constant 0 : index
    %c0_45 = arith.constant 0 : index
    %105 = vector.load %arg9[%c0_44, %c0_45] : memref<1x128xf32, #tpu.memory_space<vmem>>, vector<1x128xf32>
    %106 = vector.broadcast %105 : vector<1x128xf32> to vector<256x128xf32>
    %107 = arith.mulf %104, %106 : vector<256x128xf32>
    %c0_46 = arith.constant 0 : index
    %c0_47 = arith.constant 0 : index
    %108 = vector.load %arg10[%c0_46, %c0_47] : memref<1x128xf32, #tpu.memory_space<vmem>>, vector<1x128xf32>
    %109 = vector.broadcast %108 : vector<1x128xf32> to vector<256x128xf32>
    %110 = arith.addf %107, %109 : vector<256x128xf32>
    %111 = tpu.transpose %110, [1, 0] : vector<256x128xf32> -> vector<128x256xf32>
    %c0_48 = arith.constant 0 : index
    %c0_49 = arith.constant 0 : index
    %c0_50 = arith.constant 0 : index
    %112 = vector.load %arg1[%c0_48, %c0_49, %c0_50] : memref<1x128x256xf32, #tpu.memory_space<vmem>>, vector<1x128x256xf32>
    %113 = vector.shape_cast %112 : vector<1x128x256xf32> to vector<128x256xf32>
    %114 = arith.addf %111, %113 : vector<128x256xf32>
    %cst_51 = arith.constant 0.000000e+00 : f32
    %115 = vector.broadcast %cst_51 : f32 to vector<128x256xf32>
    %116 = arith.maximumf %114, %115 : vector<128x256xf32>
    %c0_52 = arith.constant 0 : index
    %c0_53 = arith.constant 0 : index
    %c0_54 = arith.constant 0 : index
    %117 = vector.load %arg11[%c0_52, %c0_53, %c0_54] : memref<1x128x256xf32, #tpu.memory_space<vmem>>, vector<1x128x256xf32>
    %118 = vector.shape_cast %117 : vector<1x128x256xf32> to vector<128x256xf32>
    %119 = vector.shape_cast %116 : vector<128x256xf32> to vector<1x128x256xf32>
    tpu.vector_store %arg11[%c0_52, %c0_53, %c0_54], %119 {strides = array<i32>} : memref<1x128x256xf32, #tpu.memory_space<vmem>>, vector<1x128x256xf32>,
    return
  }
  func.func @transform_0(%arg0: i32) -> (i32, i32, i32) {
    %c0_i32 = arith.constant 0 : i32
    %c0_i32_0 = arith.constant 0 : i32
    %c0_i32_1 = arith.constant 0 : i32
    return %arg0, %c0_i32, %c0_i32_0 : i32, i32, i32
  }
  func.func @transform_1(%arg0: i32) -> (i32, i32) {
    %c0_i32 = arith.constant 0 : i32
    %c0_i32_0 = arith.constant 0 : i32
    %c0_i32_1 = arith.constant 0 : i32
    return %c0_i32, %c0_i32_0 : i32, i32
  }
  func.func @transform_2(%arg0: i32) -> (i32, i32) {
    %c0_i32 = arith.constant 0 : i32
    %c0_i32_0 = arith.constant 0 : i32
    %c0_i32_1 = arith.constant 0 : i32
    return %c0_i32, %c0_i32_0 : i32, i32
  }
  func.func @transform_3(%arg0: i32) -> (i32, i32) {
    %c0_i32 = arith.constant 0 : i32
    %c0_i32_0 = arith.constant 0 : i32
    %c0_i32_1 = arith.constant 0 : i32
    return %c0_i32, %c0_i32_0 : i32, i32
  }
  func.func @transform_4(%arg0: i32) -> (i32, i32, i32) {
    %c0_i32 = arith.constant 0 : i32
    %c0_i32_0 = arith.constant 0 : i32
    %c0_i32_1 = arith.constant 0 : i32
    %c0_i32_2 = arith.constant 0 : i32
    return %c0_i32, %c0_i32_0, %c0_i32_1 : i32, i32, i32
  }
  func.func @transform_5(%arg0: i32) -> (i32, i32) {
    %c0_i32 = arith.constant 0 : i32
    %c0_i32_0 = arith.constant 0 : i32
    %c0_i32_1 = arith.constant 0 : i32
    return %c0_i32, %c0_i32_0 : i32, i32
  }
  func.func @transform_6(%arg0: i32) -> (i32, i32) {
    %c0_i32 = arith.constant 0 : i32
    %c0_i32_0 = arith.constant 0 : i32
    %c0_i32_1 = arith.constant 0 : i32
    return %c0_i32, %c0_i32_0 : i32, i32
  }
  func.func @transform_7(%arg0: i32) -> (i32, i32) {
    %c0_i32 = arith.constant 0 : i32
    %c0_i32_0 = arith.constant 0 : i32
    %c0_i32_1 = arith.constant 0 : i32
    return %c0_i32, %c0_i32_0 : i32, i32
  }
  func.func @transform_8(%arg0: i32) -> (i32, i32) {
    %c0_i32 = arith.constant 0 : i32
    %c0_i32_0 = arith.constant 0 : i32
    %c0_i32_1 = arith.constant 0 : i32
    return %c0_i32, %c0_i32_0 : i32, i32
  }
  func.func @transform_9(%arg0: i32) -> (i32, i32) {
    %c0_i32 = arith.constant 0 : i32
    %c0_i32_0 = arith.constant 0 : i32
    %c0_i32_1 = arith.constant 0 : i32
    return %c0_i32, %c0_i32_0 : i32, i32
  }
  func.func @transform_10(%arg0: i32) -> (i32, i32, i32) {
    %c0_i32 = arith.constant 0 : i32
    %c0_i32_0 = arith.constant 0 : i32
    %c0_i32_1 = arith.constant 0 : i32
    return %arg0, %c0_i32, %c0_i32_0 : i32, i32, i32
  }
}

</mosaic_0001>

<bundles_post_ra>
// kernel: bottleneck_forward.1
= control target key start
LH: loop header
LB: loop body
LE: loop exit
PB: predicated region body
PF: predicated region fallthrough
CT: control target
= control target key end

     0   :  { %s4016_s13 = smov 0   ;;  %s5406_s0 = inlined_call_operand.vmem [shape: f32[2,128,256], index: 0, kind: input, shape index: {}]   ;;  %s5407_s1 = inlined_call_operand.vmem [shape: bf16[128,128], index: 1, kind: input, shape index: {}]   ;;  %s5408_s2 = inlined_call_operand.vmem [shape: f32[1,128], index: 2, kind: input, shape index: {}]   ;;  %s5409_s3 = inlined_call_operand.vmem [shape: f32[1,128], index: 3, kind: input, shape index: {}]   ;;  %s5410_s4 = inlined_call_operand.vmem [shape: bf16[3,128,128], index: 4, kind: input, shape index: {}]   ;;  %s5411_s5 = inlined_call_operand.vmem [shape: f32[1,128], index: 5, kind: input, shape index: {}]   ;;  %s5412_s6 = inlined_call_operand.vmem [shape: f32[1,128], index: 6, kind: input, shape index: {}]   ;;  %s5413_s7 = inlined_call_operand.vmem [shape: bf16[128,128], index: 7, kind: input, shape index: {}]   ;;  %s5414_s8 = inlined_call_operand.vmem [shape: f32[1,128], index: 8, kind: input, shape index: {}]   ;;  %s5415_s9 = inlined_call_operand.vmem [shape: f32[1,128], index: 9, kind: input, shape index: {}]   ;;  %s5416_s10 = inlined_call_operand.vmem [shape: f32[2,128,256], index: 10, kind: output, shape index: {}]  }
   0x1 LB: > { %s3334_s14 = sadd.s32 4294967295, %s3957_s13   ;;  %p3338_p0 = scmp.ge.s32.totalorder %s3957_s13, 1  ;;  %s3957_s13 = sphi %s4016_s13, %s20_s13  }
   0x2   : > { %p312_p1 = scmp.lt.s32.totalorder %s3957_s13, 3 }
   0x4   : > { %p313_p2 = pnand %p3338_p0, %p312_p1 }
   0x6   : > { %316 = sbr.rel (%p313_p2) target bundleno = 1250 (0x4e2), region = 60 }
   0xd   : > { %p350_p3 = scmp.lt.s32.totalorder %s3334_s14, 1  ;;  %v3910_v0 = vld [vmem:[%s5407_s1] sm:$0xff]   ;;  %v3911_v1 = vld [vmem:[%s5407_s1 + $0x8] sm:$0xff]   ;;  %v3912_v2 = vld [vmem:[%s5407_s1 + $0x10] sm:$0xff]  }
   0xe   : > { %3580 = vmatprep.subr.bf16.mxu0 %v3910_v0  ;;  %v3913_v6 = vld [vmem:[%s5407_s1 + $0x18] sm:$0xff]   ;;  %v3914_v9 = vld [vmem:[%s5407_s1 + $0x20] sm:$0xff]   ;;  %v3915_v12 = vld [vmem:[%s5407_s1 + $0x28] sm:$0xff]  }
   0xf   : > { %s5550_s14 = smov (!%p350_p3, %s3334_s14), 1  ;;  %3581 = vmatpush3.bf16.msra.mxu0 %v3910_v0  ;;  %v3916_v15 = vld [vmem:[%s5407_s1 + $0x30] sm:$0xff]   ;;  %v3917_v18 = vld [vmem:[%s5407_s1 + $0x38] sm:$0xff]  }
  0x10   : > { %s3458_s19 = sshll.u32 %s5550_s14, 8  ;;  %3582 = vmatprep.subr.bf16.mxu0 %v3911_v1 }
  0x11   : > { %s4041_s24 = scalar_lea.vmem %s5406_s0, %s3458_s19  ;;  %s5338_s17 = scalar_lea.vmem %s5416_s10, %s3458_s19 }
  0x12   : > { %v361_v3 = vld [vmem:[%s4041_s24] sm:$0xff]  ;;  %v363_v4 = vld [vmem:[%s4041_s24 + $0x10] sm:$0xff]  ;;  %v362_v5 = vld [vmem:[%s4041_s24 + $0x8] sm:$0xff] }
  0x13   : > { %393 = vxpose.xlu0.b32.start [1/16] %v361_v3, 128  ;;  %3583 = vmatpush3.bf16.msra.mxu0 %v3911_v1  ;;  %v364_v7 = vld [vmem:[%s4041_s24 + $0x18] sm:$0xff]  ;;  %v365_v8 = vld [vmem:[%s4041_s24 + $0x20] sm:$0xff]  ;;  %v366_v10 = vld [vmem:[%s4041_s24 + $0x28] sm:$0xff] }
  0x14   : > { %3584 = vmatprep.subr.bf16.mxu0 %v3912_v2  ;;  %425 = vxpose.xlu1.b32.start [1/16] %v362_v5, 128  ;;  %v367_v11 = vld [vmem:[%s4041_s24 + $0x30] sm:$0xff]  ;;  %v368_v13 = vld [vmem:[%s4041_s24 + $0x38] sm:$0xff]  ;;  %v369_v14 = vld [vmem:[%s4041_s24 + $0x40] sm:$0xff] }
  0x15   : > { %v370_v16 = vld [vmem:[%s4041_s24 + $0x48] sm:$0xff]  ;;  %v371_v17 = vld [vmem:[%s4041_s24 + $0x50] sm:$0xff]  ;;  %v372_v19 = vld [vmem:[%s4041_s24 + $0x58] sm:$0xff] }
  0x16   : > { %v373_v20 = vld [vmem:[%s4041_s24 + $0x60] sm:$0xff]  ;;  %v374_v21 = vld [vmem:[%s4041_s24 + $0x68] sm:$0xff]  ;;  %v375_v22 = vld [vmem:[%s4041_s24 + $0x70] sm:$0xff] }
  0x17   : > { %394 = vxpose.xlu0.b32.cont [2/16] %v363_v4, 128  ;;  %3585 = vmatpush3.bf16.msra.mxu0 %v3912_v2  ;;  %v376_v23 = vld [vmem:[%s4041_s24 + $0x78] sm:$0xff]  ;;  %v377_v24 = vld [vmem:[%s4041_s24 + $0x80] sm:$0xff]  ;;  %v378_v25 = vld [vmem:[%s4041_s24 + $0x88] sm:$0xff] }
  0x18   : > { %3586 = vmatprep.subr.bf16.mxu0 %v3913_v6  ;;  %426 = vxpose.xlu1.b32.cont [2/16] %v364_v7, 128  ;;  %v379_v26 = vld [vmem:[%s4041_s24 + $0x90] sm:$0xff]  ;;  %v380_v27 = vld [vmem:[%s4041_s24 + $0x98] sm:$0xff]  ;;  %v381_v28 = vld [vmem:[%s4041_s24 + $0xa0] sm:$0xff] }
  0x19   : > { %v382_v29 = vld [vmem:[%s4041_s24 + $0xa8] sm:$0xff]  ;;  %v383_v30 = vld [vmem:[%s4041_s24 + $0xb0] sm:$0xff]  ;;  %v384_v31 = vld [vmem:[%s4041_s24 + $0xb8] sm:$0xff] }
  0x1a   : > { %v385_v32 = vld [vmem:[%s4041_s24 + $0xc0] sm:$0xff]  ;;  %v386_v33 = vld [vmem:[%s4041_s24 + $0xc8] sm:$0xff]  ;;  %v387_v34 = vld [vmem:[%s4041_s24 + $0xd0] sm:$0xff] }
  0x1b   : > { %395 = vxpose.xlu0.b32.cont [3/16] %v365_v8, 128  ;;  %3587 = vmatpush3.bf16.msra.mxu0 %v3913_v6  ;;  %v388_v35 = vld [vmem:[%s4041_s24 + $0xd8] sm:$0xff]  ;;  %v389_v36 = vld [vmem:[%s4041_s24 + $0xe0] sm:$0xff]  ;;  %v390_v37 = vld [vmem:[%s4041_s24 + $0xe8] sm:$0xff] }
  0x1c   : > { %3588 = vmatprep.subr.bf16.mxu0 %v3914_v9  ;;  %427 = vxpose.xlu1.b32.cont [3/16] %v366_v10, 128  ;;  %v391_v38 = vld [vmem:[%s4041_s24 + $0xf0] sm:$0xff]  ;;  %v392_v39 = vld [vmem:[%s4041_s24 + $0xf8] sm:$0xff] }
  0x1f   : > { %396 = vxpose.xlu0.b32.cont [4/16] %v367_v11, 128  ;;  %3589 = vmatpush3.bf16.msra.mxu0 %v3914_v9 }
  0x20   : > { %3590 = vmatprep.subr.bf16.mxu0 %v3915_v12  ;;  %428 = vxpose.xlu1.b32.cont [4/16] %v368_v13, 128 }
  0x23   : > { %397 = vxpose.xlu0.b32.cont [5/16] %v369_v14, 128  ;;  %3591 = vmatpush3.bf16.msra.mxu0 %v3915_v12 }
  0x24   : > { %3592 = vmatprep.subr.bf16.mxu0 %v3916_v15  ;;  %429 = vxpose.xlu1.b32.cont [5/16] %v370_v16, 128 }
  0x27   : > { %398 = vxpose.xlu0.b32.cont [6/16] %v371_v17, 128  ;;  %3593 = vmatpush3.bf16.msra.mxu0 %v3916_v15 }
  0x28   : > { %3594 = vmatprep.subr.bf16.mxu0 %v3917_v18  ;;  %430 = vxpose.xlu1.b32.cont [6/16] %v372_v19, 128 }
  0x2b   : > { %399 = vxpose.xlu0.b32.cont [7/16] %v373_v20, 128  ;;  %3595 = vmatpush3.bf16.msra.mxu0 %v3917_v18 }
  0x2c   : > { %431 = vxpose.xlu1.b32.cont [7/16] %v374_v21, 128 }
  0x2f   : > { %400 = vxpose.xlu0.b32.cont [8/16] %v375_v22, 128 }
  0x30   : > { %432 = vxpose.xlu1.b32.cont [8/16] %v376_v23, 128 }
  0x33   : > { %401 = vxpose.xlu0.b32.cont [9/16] %v377_v24, 128  ;;  %v3918_v24 = vld [vmem:[%s5410_s4 + $0x40] sm:$0xff]  }
  0x34   : > { %433 = vxpose.xlu1.b32.cont [9/16] %v378_v25, 128  ;;  %3628 = vmatprep.subr.bf16.mxu0 %v3918_v24  ;;  %v3919_v25 = vld [vmem:[%s5410_s4 + $0x48] sm:$0xff]  }
  0x35   : > { %3820 = vmatprep.subr.bf16.mxu1 %v3918_v24 }
  0x36   : > { %3828 = vmatpush3.bf16.msra.mxu1 %v3918_v24 }
  0x37   : > { %402 = vxpose.xlu0.b32.cont [10/16] %v379_v26, 128  ;;  %3821 = vmatprep.subr.bf16.mxu1 %v3919_v25  ;;  %v3920_v26 = vld [vmem:[%s5410_s4 + $0x50] sm:$0xff]  }
  0x38   : > { %434 = vxpose.xlu1.b32.cont [10/16] %v380_v27, 128  ;;  %v3921_v27 = vld [vmem:[%s5410_s4 + $0x58] sm:$0xff]  }
  0x3a   : > { %3829 = vmatpush3.bf16.msra.mxu1 %v3919_v25 }
  0x3b   : > { %403 = vxpose.xlu0.b32.cont [11/16] %v381_v28, 128  ;;  %3822 = vmatprep.subr.bf16.mxu1 %v3920_v26  ;;  %v3922_v28 = vld [vmem:[%s5410_s4 + $0x60] sm:$0xff]  }
  0x3c   : > { %435 = vxpose.xlu1.b32.cont [11/16] %v382_v29, 128  ;;  %v3923_v29 = vld [vmem:[%s5410_s4 + $0x68] sm:$0xff]  }
  0x3e   : > { %3830 = vmatpush3.bf16.msra.mxu1 %v3920_v26 }
  0x3f   : > { %404 = vxpose.xlu0.b32.cont [12/16] %v383_v30, 128  ;;  %3823 = vmatprep.subr.bf16.mxu1 %v3921_v27  ;;  %v3924_v30 = vld [vmem:[%s5410_s4 + $0x70] sm:$0xff]  }
  0x40   : > { %436 = vxpose.xlu1.b32.cont [12/16] %v384_v31, 128  ;;  %v3925_v31 = vld [vmem:[%s5410_s4 + $0x78] sm:$0xff]  }
  0x42   : > { %3831 = vmatpush3.bf16.msra.mxu1 %v3921_v27 }
  0x43   : > { %405 = vxpose.xlu0.b32.cont [13/16] %v385_v32, 128  ;;  %3824 = vmatprep.subr.bf16.mxu1 %v3922_v28  ;;  %v3926_v32 = vld [vmem:[%s5410_s4] sm:$0xff]  }
  0x44   : > { %437 = vxpose.xlu1.b32.cont [13/16] %v386_v33, 128  ;;  %v808_v33 = vlaneseq }
  0x46   : > { %3832 = vmatpush3.bf16.msra.mxu1 %v3922_v28 }
  0x47   : > { %406 = vxpose.xlu0.b32.cont [14/16] %v387_v34, 128  ;;  %3825 = vmatprep.subr.bf16.mxu1 %v3923_v29  ;;  %v4117_v34 = vshrl.u32 %v808_v33, 7 }
  0x48   : > { %438 = vxpose.xlu1.b32.cont [14/16] %v388_v35, 128  ;;  %v809_v35 = vand.u32 127, %v808_v33 }
  0x4a   : > { %3833 = vmatpush3.bf16.msra.mxu1 %v3923_v29  ;;  %vm813_vm0 = vcmp.ge.s32.totalorder %v809_v35, 32  ;;  %vm814_vm1 = vcmp.lt.s32.totalorder %v809_v35, 64  ;;  %vm818_vm4 = vcmp.ge.s32.totalorder %v809_v35, 64  ;;  %vm819_vm5 = vcmp.lt.s32.totalorder %v809_v35, 96 }
  0x4b   : > { %407 = vxpose.xlu0.b32.cont [15/16] %v389_v36, 128  ;;  %3826 = vmatprep.subr.bf16.mxu1 %v3924_v30  ;;  %v860_v36 = vand.u32 15, %v4117_v34  ;;  %vm815_vm2 = vmand %vm813_vm0, %vm814_vm1  ;;  %vm810_vm6 = vcmp.lt.s32.totalorder %v809_v35, 32 }
  0x4c   : > { %439 = vxpose.xlu1.b32.cont [15/16] %v390_v37, 128  ;;  %v826_v37 = vadd.s32 16, %v4117_v34  ;;  %vm820_vm7 = vmand %vm818_vm4, %vm819_vm5  ;;  %vm1464_vm5 = vcmask 1040384  }
  0x4d   : > { %vm1240_vm3 = vcmp.ne.s32.totalorder %v860_v36, 0 }
  0x4e   : > { %3834 = vmatpush3.bf16.msra.mxu1 %v3924_v30 }
  0x4f   : > { %408 = vxpose.xlu0.b32.end [16/16] %v391_v38, 128  ;;  %3827 = vmatprep.subr.bf16.mxu1 %v3925_v31  ;;  %v827_v38 = vadd.s32 24, %v4117_v34 }
  0x50   : > { %440 = vxpose.xlu1.b32.end [16/16] %v392_v39, 128  ;;  %v825_v39 = vadd.s32 8, %v4117_v34 }
  0x52   : > { %3835 = vmatpush3.bf16.msra.mxu1 %v3925_v31 }
  0x53   : > { %3676 = vmatprep.subr.bf16.mxu1 %v3926_v32 }
  0x93   : > { %v409_v40 = vpop.trf.xlu0 }
  0x94   : > { %v441_v41 = vpop.trf.xlu1 }
  0x97   : > { %v410_v42 = vpop.trf.xlu0 }
  0x98   : > { %v457_v43 = vpack.c.bf16 %v410_v42, %v409_v40  ;;  %v442_v44 = vpop.trf.xlu1  ;;  %v828_v40 = vadd.s32 32, %v4117_v34  ;;  %v874_v42 = vand.u32 15, %v826_v37 }
  0x99   : > { %v465_v11 = vpack.c.bf16 %v442_v44, %v441_v41  ;;  %v829_v41 = vadd.s32 40, %v4117_v34  ;;  %v867_v44 = vand.u32 15, %v825_v39 }
  0x9a   : > { %3596 = vmatprep.mubr.bf16.mxu0 %v457_v43  ;;  %v881_v43 = vand.u32 15, %v827_v38  ;;  %vm1242_vm8 = vcmp.ne.s32.totalorder %v874_v42, 0  ;;  %v845_v38 = vadd.s32 168, %v4117_v34 }
  0x9b   : > { %v411_v45 = vpop.trf.xlu0  ;;  %vm1337_vm10 = vcmp.ne.s32.totalorder %v867_v44, 15 }
  0x9c   : > { %v443_v47 = vpop.trf.xlu1  ;;  %vm4139_vm9 = vcmp.ne.s32.totalorder %v881_v43, 15  ;;  %v846_v43 = vadd.s32 176, %v4117_v34 }
  0x9f   : > { %v412_v46 = vpop.trf.xlu0 }
  0xa0   : > { %v458_v48 = vpack.c.bf16 %v412_v46, %v411_v45  ;;  %v444_v50 = vpop.trf.xlu1  ;;  %v830_v45 = vadd.s32 48, %v4117_v34  ;;  %v888_v46 = vand.u32 15, %v828_v40 }
  0xa1   : > { %v466_v13 = vpack.c.bf16 %v444_v50, %v443_v47  ;;  %v831_v47 = vadd.s32 56, %v4117_v34  ;;  %v895_v50 = vand.u32 15, %v829_v41 }
  0xa2   : > { %3597 = vmatmul.mubr.bf16.vlgmr.msra.gmra.mrb[0].mxu0 %v458_v48  ;;  %v3959_v48 = vmov 0.0   ;;  %vm1244_vm11 = vcmp.ne.s32.totalorder %v888_v46, 0 }
  0xa3   : > { %v413_v49 = vpop.trf.xlu0  ;;  %3629 = vmatpush3.bf16.msra.mxu0 %v3918_v24  ;;  %vm1341_vm12 = vcmp.ne.s32.totalorder %v895_v50, 15 }
  0xa4   : > { %v445_v54 = vpop.trf.xlu1  ;;  %3630 = vmatprep.subr.bf16.mxu0 %v3919_v25 }
  0xa7   : > { %v414_v51 = vpop.trf.xlu0  ;;  %3631 = vmatpush3.bf16.msra.mxu0 %v3919_v25  ;;  %v4346_v25 = vadd.s32 216, %v4117_v34 }
  0xa8   : > { %v459_v52 = vpack.c.bf16 %v414_v51, %v413_v49  ;;  %v446_v57 = vpop.trf.xlu1  ;;  %3632 = vmatprep.subr.bf16.mxu0 %v3920_v26  ;;  %v4128_v49 = vsel %vm815_vm2, 1.0, %v3959_v48  ;;  %v832_v51 = vadd.s32 64, %v4117_v34 }
  0xa9   : > { %v467_v14 = vpack.c.bf16 %v446_v57, %v445_v54  ;;  %v833_v54 = vadd.s32 72, %v4117_v34  ;;  %v834_v57 = vadd.s32 80, %v4117_v34 }
  0xaa   : > { %3600 = vmatprep.mubr.bf16.mxu0 %v459_v52  ;;  %v4132_v52 = vsel %vm1240_vm3, 1.0, %v3959_v48 }
  0xab   : > { %v415_v53 = vpop.trf.xlu0  ;;  %3633 = vmatpush3.bf16.msra.mxu0 %v3920_v26 }
  0xac   : > { %v447_v60 = vpop.trf.xlu1  ;;  %3634 = vmatprep.subr.bf16.mxu0 %v3921_v27 }
  0xaf   : > { %v416_v55 = vpop.trf.xlu0  ;;  %3635 = vmatpush3.bf16.msra.mxu0 %v3921_v27 }
  0xb0   : > { %v460_v56 = vpack.c.bf16 %v416_v55, %v415_v53  ;;  %v448_v63 = vpop.trf.xlu1  ;;  %3636 = vmatprep.subr.bf16.mxu0 %v3922_v28  ;;  %v4135_v53 = vsel %vm810_vm6, 1.0, %v3959_v48 }
  0xb1   : > { %v468_v16 = vpack.c.bf16 %v448_v63, %v447_v60  ;;  %v836_v60 = vadd.s32 96, %v4117_v34  ;;  %v837_v63 = vadd.s32 104, %v4117_v34 }
  0xb2   : > { %3601 = vmatmul.mubr.bf16.gmra.mrb[4].mxu0 %v460_v56  ;;  %v902_v56 = vand.u32 15, %v830_v45 }
  0xb3   : > { %v417_v58 = vpop.trf.xlu0  ;;  %3637 = vmatpush3.bf16.msra.mxu0 %v3922_v28  ;;  %v4206_v28 = vld [vmem:[%s5409_s3] ss:$0 sm:$0xff] }
  0xb4   : > { %v449_v3 = vpop.trf.xlu1  ;;  %3638 = vmatprep.subr.bf16.mxu0 %v3923_v29  ;;  %vm1246_vm13 = vcmp.ne.s32.totalorder %v902_v56, 0 }
  0xb7   : > { %v418_v59 = vpop.trf.xlu0  ;;  %3639 = vmatpush3.bf16.msra.mxu0 %v3923_v29 }
  0xb8   : > { %v461_v61 = vpack.c.bf16 %v418_v59, %v417_v58  ;;  %v450_v6 = vpop.trf.xlu1  ;;  %3640 = vmatprep.subr.bf16.mxu0 %v3924_v30  ;;  %v909_v58 = vand.u32 15, %v831_v47  ;;  %v835_v59 = vadd.s32 88, %v4117_v34 }
  0xb9   : > { %v469_v17 = vpack.c.bf16 %v450_v6, %v449_v3  ;;  %v838_v3 = vadd.s32 112, %v4117_v34  ;;  %v930_v6 = vand.u32 15, %v834_v57 }
  0xba   : > { %3604 = vmatprep.mubr.bf16.mxu0 %v461_v61  ;;  %v4147_v61 = vsel %vm820_vm7, 1.0, %v3959_v48  ;;  %vm1343_vm14 = vcmp.ne.s32.totalorder %v909_v58, 15  ;;  %vm1561_vm7 = vcmask 1046528   ;;  %v1007_v58 = vand.u32 15, %v845_v38 }
  0xbb   : > { %v419_v62 = vpop.trf.xlu0  ;;  %3641 = vmatpush3.bf16.msra.mxu0 %v3924_v30  ;;  %vm1250_vm1 = vcmp.ne.s32.totalorder %v930_v6, 0 }
  0xbc   : > { %v451_v9 = vpop.trf.xlu1  ;;  %3642 = vmatprep.subr.bf16.mxu0 %v3925_v31  ;;  %v4209_v29 = vsel %vm1250_vm1, 1.0, %v3959_v48 }
  0xbf   : > { %v420_v0 = vpop.trf.xlu0  ;;  %3643 = vmatpush3.bf16.msra.mxu0 %v3925_v31 }
  0xc0   : > { %v462_v1 = vpack.c.bf16 %v420_v0, %v419_v62  ;;  %v452_v12 = vpop.trf.xlu1  ;;  %v916_v62 = vand.u32 15, %v832_v51  ;;  %v4151_v0 = vsel %vm1242_vm8, 1.0, %v3959_v48 }
  0xc1   : > { %v470_v20 = vpack.c.bf16 %v452_v12, %v451_v9  ;;  %v944_v9 = vand.u32 15, %v836_v60  ;;  %v840_v12 = vadd.s32 128, %v4117_v34 }
  0xc2   : > { %3605 = vmatmul.mubr.bf16.gmra.mrb[8].mxu0 %v462_v1  ;;  %v4154_v1 = vsel %vm1337_vm10, 1.0, %v3959_v48  ;;  %vm1248_vm15 = vcmp.ne.s32.totalorder %v916_v62, 0  ;;  %v1014_v62 = vand.u32 15, %v846_v43 }
  0xc3   : > { %v421_v2 = vpop.trf.xlu0  ;;  %vm4186_vm3 = vcmp.ne.s32.totalorder %v944_v9, 0  ;;  %v972_v27 = vand.u32 15, %v840_v12 }
  0xc4   : > { %v453_v15 = vpop.trf.xlu1  ;;  %v4223_v36 = vsel %vm4186_vm3, 1.0, %v3959_v48 }
  0xc7   : > { %v422_v4 = vpop.trf.xlu0 }
  0xc8   : > { %v463_v5 = vpack.c.bf16 %v422_v4, %v421_v2  ;;  %v454_v18 = vpop.trf.xlu1  ;;  %v923_v2 = vand.u32 15, %v833_v54  ;;  %v4160_v4 = vsel %vm4139_vm9, 1.0, %v3959_v48  ;;  %vm4243_vm9 = vcmp.ne.s32.totalorder %v972_v27, 0 }
  0xc9   : > { %v471_v21 = vpack.c.bf16 %v454_v18, %v453_v15  ;;  %v842_v15 = vadd.s32 144, %v4117_v34  ;;  %v843_v18 = vadd.s32 152, %v4117_v34  ;;  %v4261_v6 = vsel %vm4243_vm9, 1.0, %v3959_v48 }
  0xca   : > { %3608 = vmatprep.mubr.bf16.mxu0 %v463_v5  ;;  %v4163_v5 = vsel %vm1244_vm11, 1.0, %v3959_v48  ;;  %vm1345_vm0 = vcmp.ne.s32.totalorder %v923_v2, 15 }
  0xcb   : > { %v423_v7 = vpop.trf.xlu0  ;;  %v4197_v24 = vsel %vm1345_vm0, 1.0, %v3959_v48  ;;  %v986_v32 = vand.u32 15, %v842_v15  ;;  %v993_v37 = vand.u32 15, %v843_v18 }
  0xcc   : > { %v455_v19 = vpop.trf.xlu1 }
  0xcd   : > { %vm1258_vm11 = vcmp.ne.s32.totalorder %v986_v32, 0 }
  0xcf   : > { %v424_v8 = vpop.trf.xlu0 }
  0xd0   : > { %v464_v10 = vpack.c.bf16 %v424_v8, %v423_v7  ;;  %v456_v22 = vpop.trf.xlu1  ;;  %v4166_v7 = vsel %vm1341_vm12, 1.0, %v3959_v48  ;;  %v937_v8 = vand.u32 15, %v835_v59  ;;  %vm1355_vm12 = vcmp.ne.s32.totalorder %v993_v37, 15 }
  0xd1   : > { %v472_v23 = vpack.c.bf16 %v456_v22, %v455_v19  ;;  %v4180_v19 = vsel %vm1248_vm15, 1.0, %v3959_v48  ;;  %v844_v22 = vadd.s32 160, %v4117_v34  ;;  %vm4283_vm15 = vcmp.ne.s32.totalorder %v1014_v62, 0 }
  0xd2   : > { %3609 = vmatmul.mubr.bf16.gmra.mrb[12].mxu0 %v464_v10  ;;  %v951_v10 = vand.u32 15, %v837_v63  ;;  %vm4182_vm2 = vcmp.ne.s32.totalorder %v937_v8, 15 }
  0xd3   : > { %3612 = vmatprep.mubr.bf16.mxu0 %v465_v11  ;;  %v839_v11 = vadd.s32 120, %v4117_v34  ;;  %v4218_v35 = vsel %vm4182_vm2, 1.0, %v3959_v48  ;;  %v1000_v42 = vand.u32 15, %v844_v22 }
  0xd4   : > { %vm4199_vm4 = vcmp.ne.s32.totalorder %v951_v10, 15  ;;  %v4269_v10 = vsel %vm1258_vm11, 1.0, %v3959_v48 }
  0xd5   : > { %v965_v26 = vand.u32 15, %v839_v11  ;;  %v4230_v41 = vsel %vm4199_vm4, 1.0, %v3959_v48  ;;  %v4272_v11 = vsel %vm1355_vm12, 1.0, %v3959_v48 }
  0xd7   : > { %vm4239_vm8 = vcmp.ne.s32.totalorder %v965_v26, 15 }
  0xda   : > { %3613 = vmatmul.mubr.bf16.gmra.mrb[16].mxu0 %v466_v13  ;;  %v958_v13 = vand.u32 15, %v838_v3  ;;  %v4256_v3 = vsel %vm4239_vm8, 1.0, %v3959_v48 }
  0xdb   : > { %3616 = vmatprep.mubr.bf16.mxu0 %v467_v14  ;;  %v841_v14 = vadd.s32 136, %v4117_v34 }
  0xdc   : > { %vm4211_vm6 = vcmp.ne.s32.totalorder %v958_v13, 0 }
  0xdd   : > { %v979_v31 = vand.u32 15, %v841_v14  ;;  %v4237_v46 = vsel %vm4211_vm6, 1.0, %v3959_v48 }
  0xdf   : > { %vm1353_vm10 = vcmp.ne.s32.totalorder %v979_v31, 15 }
  0xe0   : > { %v4266_v9 = vsel %vm1353_vm10, 1.0, %v3959_v48 }
  0xe2   : > { %3617 = vmatmul.mubr.bf16.gmra.mrb[20].mxu0 %v468_v16  ;;  %v4173_v16 = vsel %vm1246_vm13, 1.0, %v3959_v48  ;;  %vm1260_vm13 = vcmp.ne.s32.totalorder %v1000_v42, 0 }
  0xe3   : > { %3620 = vmatprep.mubr.bf16.mxu0 %v469_v17  ;;  %v4176_v17 = vsel %vm1343_vm14, 1.0, %v3959_v48  ;;  %v4275_v14 = vsel %vm1260_vm13, 1.0, %v3959_v48  ;;  %vm4277_vm14 = vcmp.ne.s32.totalorder %v1007_v58, 15 }
  0xea   : > { %3621 = vmatmul.mubr.bf16.gmra.mrb[24].mxu0 %v470_v20 }
  0xeb   : > { %3624 = vmatprep.mubr.bf16.mxu0 %v471_v21 }
  0xf2   : > { %3625 = vmatmul.mubr.bf16.gmra.mrb[28].mxu0 %v472_v23  ;;  %v4194_v23 = vld [vmem:[%s5408_s2] ss:$0 sm:$0xff] }
 0x175   : > { %v3598_v33 = vpop.f32.mrb[0].mxu0 }
 0x176   : > { %v707_v39 = vmul.f32 %v3598_v33, %v4194_v23  ;;  %v571_v40 = vpop.f32.mrb[1].mxu0 }
 0x177   : > { %v705_v44 = vmul.f32 %v4194_v23, %v571_v40  ;;  %v3599_v45 = vpop.f32.mrb[2].mxu0 }
 0x178   : > { %v746_v51 = vadd.f32 %v4206_v28, %v707_v39  ;;  %v708_v54 = vmul.f32 %v3599_v45, %v4194_v23  ;;  %v574_v55 = vpop.f32.mrb[3].mxu0 }
 0x179   : > { %v744_v56 = vadd.f32 %v4206_v28, %v705_v44  ;;  %v706_v57 = vmul.f32 %v4194_v23, %v574_v55 }
 0x17a   : > { %v778_v59 = vmax.f32 %v746_v51, 0.0  ;;  %v747_v60 = vadd.f32 %v4206_v28, %v708_v54 }
 0x17b   : > { %v776_v63 = vmax.f32 %v744_v56, 0.0  ;;  %v745_v2 = vadd.f32 %v4206_v28, %v706_v57 }
 0x17c   : > { %v4263_v8 = vmax.f32 %v747_v60, 0.0  ;;  %v1468_v18 = vrot.slane %v778_v59, 7  ;;  %v1565_v20 = vrot.slane %v778_v59, 1  ;;  %v1724_v56 = vmul.f32 %v4128_v49, %v778_v59 }
 0x17d   : > { %v1465_v12 = vrot.slane %v776_v63, 7  ;;  %v777_v13 = vmax.f32 %v745_v2, 0.0  ;;  %v1562_v27 = vrot.slane %v776_v63, 1  ;;  %v1722_v33 = vmul.f32 %v4128_v49, %v776_v63 }
 0x17e   : > { %v1470_v21 = vrot.slane %v4263_v8, 7  ;;  %v1567_v22 = vrot.slane %v4263_v8, 1  ;;  %v1725_v40 = vmul.f32 %v4128_v49, %v4263_v8  ;;  %v847_v2 = vadd.s32 184, %v4117_v34 }
 0x17f   : > { %v1560_v26 = vsel %vm1464_vm5, 0.0, %v1465_v12  ;;  %v1466_v30 = vrot.slane %v777_v13, 7  ;;  %v1563_v31 = vrot.slane %v777_v13, 1  ;;  %v1723_v51 = vmul.f32 %v4128_v49, %v777_v13 }
 0x180   : > { %v1658_v32 = vmul.f32 %v4132_v52, %v1560_v26  ;;  %v1471_v37 = vsel %vm1464_vm5, %v1468_v18, %v1470_v21  ;;  %v1568_v38 = vsel %vm1561_vm7, %v1565_v20, %v1567_v22 }
 0x181   : > { %v1693_v39 = vmul.f32 %v4135_v53, %v1471_v37  ;;  %v1469_v42 = vsel %vm1464_vm5, %v1466_v30, %v1468_v18  ;;  %v1467_v43 = vsel %vm1464_vm5, %v1465_v12, %v1466_v30  ;;  %v1564_v44 = vsel %vm1561_vm7, %v1562_v27, %v1563_v31 }
 0x182   : > { %v1660_v52 = vmul.f32 %v4151_v0, %v1469_v42  ;;  %v1566_v45 = vsel %vm1561_vm7, %v1563_v31, %v1565_v20  ;;  %v1690_v47 = vmul.f32 %v4135_v53, %v1658_v32  ;;  %v1691_v54 = vmul.f32 %v4135_v53, %v1467_v43 }
 0x183   : > { %v4305_v50 = vadd.f32 %v1725_v40, %v1693_v39  ;;  %v1787_v55 = vmul.f32 %v4154_v1, %v1566_v45  ;;  %v1818_v0 = vmul.f32 %v4147_v61, %v1564_v44  ;;  %v848_v12 = vadd.s32 192, %v4117_v34 }
 0x184   : > { %v1692_v57 = vmul.f32 %v4135_v53, %v1660_v52  ;;  %v1754_v58 = vadd.f32 %v1722_v33, %v1690_v47  ;;  %v1755_v62 = vadd.f32 %v1723_v51, %v1691_v54  ;;  %v1820_v13 = vmul.f32 %v4147_v61, %v1568_v38 }
 0x185   : > { %v3602_v60 = vpop.f32.mrb[4].mxu0  ;;  %v1819_v63 = vmul.f32 %v4147_v61, %v1787_v55  ;;  %v849_v31 = vadd.s32 200, %v4117_v34  ;;  %v4321_v32 = vadd.s32 208, %v4117_v34  ;;  %v4328_v40 = vsel %vm4277_vm14, 1.0, %v3959_v48 }
 0x186   : > { %v711_v18 = vmul.f32 %v3602_v60, %v4194_v23  ;;  %v587_v1 = vpop.f32.mrb[5].mxu0  ;;  %v1850_v20 = vadd.f32 %v1818_v0, %v1754_v58  ;;  %v1756_v59 = vadd.f32 %v1724_v56, %v1692_v57  ;;  %v4337_v44 = vsel %vm4283_vm15, 1.0, %v3959_v48 }
 0x187   : > { %v709_v26 = vmul.f32 %v4194_v23, %v587_v1  ;;  %v3603_v27 = vpop.f32.mrb[6].mxu0  ;;  %v1851_v30 = vadd.f32 %v1819_v63, %v1755_v62  ;;  %v1021_v51 = vand.u32 15, %v847_v2  ;;  %v1028_v54 = vand.u32 15, %v848_v12 }
 0x188   : > { %v750_v33 = vadd.f32 %v4206_v28, %v711_v18  ;;  %v712_v37 = vmul.f32 %v3603_v27, %v4194_v23  ;;  %v590_v39 = vpop.f32.mrb[7].mxu0  ;;  %v1852_v38 = vadd.f32 %v1820_v13, %v1756_v59  ;;  %v1035_v56 = vand.u32 15, %v849_v31 }
 0x189   : > { %v748_v42 = vadd.f32 %v4206_v28, %v709_v26  ;;  %v710_v43 = vmul.f32 %v4194_v23, %v590_v39  ;;  %v4332_v52 = vpack.c.bf16 %v1851_v30, %v1850_v20  ;;  %v1042_v57 = vand.u32 15, %v4321_v32 }
 0x18a   : > { %v782_v45 = vmax.f32 %v750_v33, 0.0  ;;  %v751_v47 = vadd.f32 %v4206_v28, %v712_v37  ;;  %v4349_v60 = vadd.s32 224, %v4117_v34  ;;  %vm4356_vm0 = vcmp.ne.s32.totalorder %v1021_v51, 15 }
 0x18b   : > { %5461 = vst [vmem:[#allocation3_spill] sm:$0xff] %v4332_v52  ;;  %v780_v55 = vmax.f32 %v748_v42, 0.0  ;;  %v749_v15 = vadd.f32 %v4206_v28, %v710_v43  ;;  %3644 = vmatprep.mubr.bf16.mxu0 %v4332_v52  ;;  %vm4366_vm1 = vcmp.ne.s32.totalorder %v1028_v54, 0  ;;  %vm4370_vm2 = vcmp.ne.s32.totalorder %v1035_v56, 15 }
 0x18c   : > { %v1476_v58 = vrot.slane %v782_v45, 7  ;;  %v4343_v0 = vmax.f32 %v751_v47, 0.0  ;;  %v1573_v62 = vrot.slane %v782_v45, 1  ;;  %vm4456_vm3 = vcmp.ne.s32.totalorder %v1042_v57, 0 }
 0x18d   : > { %v1472_v63 = vrot.slane %v780_v55, 7  ;;  %v1569_v2 = vrot.slane %v780_v55, 1  ;;  %v781_v12 = vmax.f32 %v749_v15, 0.0  ;;  %v1726_v13 = vmul.f32 %v4128_v49, %v780_v55 }
 0x18e   : > { %v1478_v18 = vrot.slane %v4343_v0, 7  ;;  %v1575_v1 = vrot.slane %v4343_v0, 1  ;;  %v1729_v20 = vmul.f32 %v4128_v49, %v4343_v0 }
 0x18f   : > { %v1473_v26 = vsel %vm1464_vm5, %v1470_v21, %v1472_v63  ;;  %v1570_v27 = vsel %vm1561_vm7, %v1567_v22, %v1569_v2  ;;  %v1474_v30 = vrot.slane %v781_v12, 7  ;;  %v1571_v31 = vrot.slane %v781_v12, 1 }
 0x190   : > { %v1789_v39 = vmul.f32 %v4160_v4, %v1570_v27  ;;  %v1727_v42 = vmul.f32 %v4128_v49, %v781_v12  ;;  %v1662_v21 = vmul.f32 %v4163_v5, %v1473_v26  ;;  %v1479_v8 = vsel %vm1464_vm5, %v1476_v58, %v1478_v18 }
 0x191   : > { %v1477_v22 = vsel %vm1464_vm5, %v1474_v30, %v1476_v58  ;;  %v1475_v43 = vsel %vm1464_vm5, %v1472_v63, %v1474_v30  ;;  %v1572_v47 = vsel %vm1561_vm7, %v1569_v2, %v1571_v31  ;;  %v1574_v51 = vsel %vm1561_vm7, %v1571_v31, %v1573_v62 }
 0x192   : > { %v1821_v54 = vmul.f32 %v4147_v61, %v1789_v39  ;;  %v1694_v4 = vmul.f32 %v4135_v53, %v1662_v21  ;;  %v1695_v55 = vmul.f32 %v4135_v53, %v1475_v43  ;;  %v1791_v5 = vmul.f32 %v4166_v7, %v1574_v51 }
 0x193   : > { %v1822_v15 = vmul.f32 %v4147_v61, %v1572_v47  ;;  %v1576_v56 = vsel %vm1561_vm7, %v1573_v62, %v1575_v1  ;;  %v1664_v58 = vmul.f32 %v4173_v16, %v1477_v22  ;;  %v1697_v63 = vmul.f32 %v4135_v53, %v1479_v8 }
 0x194   : > { %v1853_v2 = vadd.f32 %v1821_v54, %v4305_v50  ;;  %v1758_v12 = vadd.f32 %v1726_v13, %v1694_v4  ;;  %v1759_v26 = vadd.f32 %v1727_v42, %v1695_v55  ;;  %v1823_v27 = vmul.f32 %v4147_v61, %v1791_v5 }
 0x195   : > { %v1728_v30 = vmul.f32 %v4128_v49, %v782_v45  ;;  %v3606_v31 = vpop.f32.mrb[8].mxu0  ;;  %v1696_v7 = vmul.f32 %v4135_v53, %v1664_v58  ;;  %v4398_v39 = vadd.f32 %v1729_v20, %v1697_v63  ;;  %v4401_v21 = vadd.s32 248, %v4117_v34 }
 0x196   : > { %v715_v16 = vmul.f32 %v3606_v31, %v4194_v23  ;;  %v603_v62 = vpop.f32.mrb[9].mxu0  ;;  %v4404_v8 = vpack.c.bf16 %v1853_v2, %v1852_v38  ;;  %v1854_v50 = vadd.f32 %v1822_v15, %v1758_v12  ;;  %v1855_v13 = vadd.f32 %v1823_v27, %v1759_v26 }
 0x197   : > { %v713_v42 = vmul.f32 %v4194_v23, %v603_v62  ;;  %v3607_v22 = vpop.f32.mrb[10].mxu0  ;;  %v1760_v43 = vadd.f32 %v1728_v30, %v1696_v7  ;;  %v1824_v45 = vmul.f32 %v4147_v61, %v1576_v56  ;;  %v4409_v47 = vadd.s32 232, %v4117_v34 }
 0x198   : > { %5468 = vst [vmem:[#allocation4_spill] sm:$0xff] %v4404_v8  ;;  %v754_v20 = vadd.f32 %v4206_v28, %v715_v16  ;;  %v716_v51 = vmul.f32 %v3607_v22, %v4194_v23  ;;  %v606_v54 = vpop.f32.mrb[11].mxu0  ;;  %3645 = vmatmul.mubr.bf16.vlgmr.msra.gmra.mrb[32].mxu0 %v4404_v8  ;;  %v4414_v38 = vpack.c.bf16 %v1855_v13, %v1854_v50  ;;  %v4417_v4 = vadd.s32 240, %v4117_v34 }
 0x199   : > { %v752_v55 = vadd.f32 %v4206_v28, %v713_v42  ;;  %v714_v5 = vmul.f32 %v4194_v23, %v606_v54  ;;  %v1856_v15 = vadd.f32 %v1824_v45, %v1760_v43  ;;  %v4424_v56 = vsel %vm4356_vm0, 1.0, %v3959_v48 }
 0x19a   : > { %5469 = vst [vmem:[#allocation5_spill] sm:$0xff] %v4414_v38  ;;  %v786_v58 = vmax.f32 %v754_v20, 0.0  ;;  %v755_v63 = vadd.f32 %v4206_v28, %v716_v51  ;;  %3648 = vmatprep.mubr.bf16.mxu0 %v4414_v38  ;;  %v4431_v34 = vsel %vm4366_vm1, 1.0, %v3959_v48  ;;  %v4436_v2 = vsel %vm4370_vm2, 1.0, %v3959_v48 }
 0x19b   : > { %v784_v12 = vmax.f32 %v752_v55, 0.0  ;;  %v753_v59 = vadd.f32 %v4206_v28, %v714_v5  ;;  %v1049_v26 = vand.u32 15, %v4346_v25  ;;  %v1056_v27 = vand.u32 15, %v4349_v60 }
 0x19c   : > { %v4441_v30 = vmax.f32 %v755_v63, 0.0  ;;  %v1063_v31 = vand.u32 15, %v4409_v47  ;;  %v1070_v33 = vand.u32 15, %v4417_v4  ;;  %v1077_v7 = vand.u32 15, %v4401_v21 }
 0x19d   : > { %v1484_v16 = vrot.slane %v786_v58, 7  ;;  %v1480_v62 = vrot.slane %v784_v12, 7  ;;  %v1577_v37 = vrot.slane %v784_v12, 1  ;;  %v785_v50 = vmax.f32 %v753_v59, 0.0 }
 0x19e   : > { %v1581_v13 = vrot.slane %v786_v58, 1  ;;  %v1730_v42 = vmul.f32 %v4128_v49, %v784_v12  ;;  %v1486_v22 = vrot.slane %v4441_v30, 7  ;;  %v1583_v25 = vrot.slane %v4441_v30, 1 }
 0x19f   : > { %v1481_v60 = vsel %vm1464_vm5, %v1478_v18, %v1480_v62  ;;  %v1733_v43 = vmul.f32 %v4128_v49, %v4441_v30  ;;  %v1482_v45 = vrot.slane %v785_v50, 7  ;;  %v1579_v21 = vrot.slane %v785_v50, 1 }
 0x1a0   : > { %vm4460_vm4 = vcmp.ne.s32.totalorder %v1049_v26, 15  ;;  %v1578_v51 = vsel %vm1561_vm7, %v1575_v1, %v1577_v37  ;;  %v1666_v18 = vmul.f32 %v4180_v19, %v1481_v60  ;;  %v1487_v54 = vsel %vm1464_vm5, %v1484_v16, %v1486_v22 }
 0x1a1   : > { %v1584_v32 = vsel %vm1561_vm7, %v1581_v13, %v1583_v25  ;;  %vm4474_vm6 = vcmp.ne.s32.totalorder %v1056_v27, 0  ;;  %v1485_v4 = vsel %vm1464_vm5, %v1482_v45, %v1484_v16  ;;  %v1793_v0 = vmul.f32 %v4176_v17, %v1578_v51 }
 0x1a2   : > { %v1483_v1 = vsel %vm1464_vm5, %v1480_v62, %v1482_v45  ;;  %v1580_v19 = vsel %vm1561_vm7, %v1577_v37, %v1579_v21  ;;  %v1731_v55 = vmul.f32 %v4128_v49, %v785_v50  ;;  %v1582_v5 = vsel %vm1561_vm7, %v1579_v21, %v1581_v13 }
 0x1a3   : > { %v1698_v63 = vmul.f32 %v4135_v53, %v1666_v18  ;;  %v1699_v12 = vmul.f32 %v4135_v53, %v1483_v1  ;;  %v1825_v59 = vmul.f32 %v4147_v61, %v1793_v0  ;;  %v1795_v26 = vmul.f32 %v4197_v24, %v1582_v5 }
 0x1a4   : > { %v1668_v27 = vmul.f32 %v4209_v29, %v1485_v4  ;;  %v1701_v17 = vmul.f32 %v4135_v53, %v1487_v54  ;;  %v1732_v16 = vmul.f32 %v4128_v49, %v786_v58  ;;  %v1826_v50 = vmul.f32 %v4147_v61, %v1580_v19 }
 0x1a5   : > { %v1762_v62 = vadd.f32 %v1730_v42, %v1698_v63  ;;  %v1763_v37 = vadd.f32 %v1731_v55, %v1699_v12  ;;  %v3610_v60 = vpop.f32.mrb[12].mxu0  ;;  %v1857_v13 = vadd.f32 %v1825_v59, %v4398_v39  ;;  %v1827_v45 = vmul.f32 %v4147_v61, %v1795_v26 }
 0x1a6   : > { %v1700_v21 = vmul.f32 %v4135_v53, %v1668_v27  ;;  %v4495_v51 = vadd.f32 %v1733_v43, %v1701_v17  ;;  %v719_v24 = vmul.f32 %v3610_v60, %v4194_v23  ;;  %v619_v29 = vpop.f32.mrb[13].mxu0  ;;  %v1828_v54 = vmul.f32 %v4147_v61, %v1584_v32 }
 0x1a7   : > { %v1858_v18 = vadd.f32 %v1826_v50, %v1762_v62  ;;  %vm4499_vm8 = vcmp.ne.s32.totalorder %v1077_v7, 15  ;;  %v717_v42 = vmul.f32 %v4194_v23, %v619_v29  ;;  %v3611_v4 = vpop.f32.mrb[14].mxu0  ;;  %v4504_v39 = vpack.c.bf16 %v1857_v13, %v1856_v15 }
 0x1a8   : > { %v1859_v0 = vadd.f32 %v1827_v45, %v1763_v37  ;;  %v1764_v1 = vadd.f32 %v1732_v16, %v1700_v21  ;;  %v758_v43 = vadd.f32 %v4206_v28, %v719_v24  ;;  %v720_v19 = vmul.f32 %v3611_v4, %v4194_v23  ;;  %v622_v55 = vpop.f32.mrb[15].mxu0 }
 0x1a9   : > { %5478 = vst [vmem:[#allocation6_spill] sm:$0xff] %v4504_v39  ;;  %vm4508_vm9 = vcmp.ne.s32.totalorder %v1063_v31, 15  ;;  %vm4512_vm10 = vcmp.ne.s32.totalorder %v1070_v33, 0  ;;  %v756_v32 = vadd.f32 %v4206_v28, %v717_v42  ;;  %v718_v15 = vmul.f32 %v4194_v23, %v622_v55  ;;  %3649 = vmatmul.mubr.bf16.gmra.mrb[36].mxu0 %v4504_v39 }
 0x1aa   : > { %v4519_v63 = vpack.c.bf16 %v1859_v0, %v1858_v18  ;;  %v4521_v12 = vadd.f32 %v1828_v54, %v1764_v1  ;;  %v4523_v59 = vmax.f32 %v758_v43, 0.0  ;;  %v759_v31 = vadd.f32 %v4206_v28, %v720_v19 }
 0x1ab   : > { %v4529_v33 = vsel %vm4456_vm3, 1.0, %v3959_v48  ;;  %v4534_v26 = vsel %vm4460_vm4, 1.0, %v3959_v48  ;;  %v788_v27 = vmax.f32 %v756_v32, 0.0  ;;  %v757_v17 = vadd.f32 %v4206_v28, %v718_v15 }
 0x1ac   : > { %5483 = vst [vmem:[#allocation7_spill] sm:$0xff] %v4519_v63  ;;  %3652 = vmatprep.mubr.bf16.mxu0 %v4519_v63  ;;  %v4541_v16 = vsel %vm4474_vm6, 1.0, %v3959_v48  ;;  %v4546_v47 = vsel %vm4499_vm8, 1.0, %v3959_v48  ;;  %v5419_v62 = vrot.slane %v4523_v59, 7  ;;  %v4549_v20 = vmax.f32 %v759_v31, 0.0 }
 0x1ad   : > { %5484 = vst [vmem:[#allocation8_spill] sm:$0xff] %v4541_v16  ;;  %5485 = vst [vmem:[#allocation9_spill] sm:$0xff] %v4546_v47  ;;  %v4554_v37 = vsel %vm4508_vm9, 1.0, %v3959_v48  ;;  %v4559_v57 = vsel %vm4512_vm10, 1.0, %v3959_v48  ;;  %v5417_v50 = vrot.slane %v4523_v59, 1  ;;  %v1488_v60 = vrot.slane %v788_v27, 7 }
 0x1ae   : > { %5486 = vst [vmem:[#allocation10_spill] sm:$0xff] %v4554_v37  ;;  %5487 = vst [vmem:[#allocation11_spill] sm:$0xff] %v4559_v57  ;;  %v1585_v13 = vrot.slane %v788_v27, 1  ;;  %v789_v45 = vmax.f32 %v757_v17, 0.0  ;;  %v3614_v21 = vpop.f32.mrb[16].mxu0  ;;  %v4564_v24 = vmul.f32 %v4128_v49, %v4523_v59  ;;  %v1734_v29 = vmul.f32 %v4128_v49, %v788_v27 }
 0x1af   : > { %v5420_v18 = vrot.slane %v4549_v20, 7  ;;  %v723_v54 = vmul.f32 %v3614_v21, %v4194_v23  ;;  %v635_v58 = vpop.f32.mrb[17].mxu0  ;;  %v1489_v48 = vsel %vm1464_vm5, %v1486_v22, %v1488_v60 }
 0x1b0   : > { %v1490_v4 = vrot.slane %v789_v45, 7  ;;  %v1587_v0 = vrot.slane %v789_v45, 1  ;;  %v3615_v1 = vpop.f32.mrb[18].mxu0  ;;  %v721_v19 = vmul.f32 %v4194_v23, %v635_v58  ;;  %v1586_v7 = vsel %vm1561_vm7, %v1583_v25, %v1585_v13 }
 0x1b1   : > { %v762_v43 = vadd.f32 %v4206_v28, %v723_v54  ;;  %v724_v55 = vmul.f32 %v3615_v1, %v4194_v23  ;;  %v638_v5 = vpop.f32.mrb[19].mxu0  ;;  %v1797_v15 = vmul.f32 %v4218_v35, %v1586_v7  ;;  %v1670_v35 = vmul.f32 %v4223_v36, %v1489_v48 }
 0x1b2   : > { %v4582_v22 = vsel %vm1464_vm5, %v1490_v4, %v5419_v62  ;;  %v722_v32 = vmul.f32 %v4194_v23, %v638_v5  ;;  %v1491_v31 = vsel %vm1464_vm5, %v1488_v60, %v1490_v4  ;;  %v760_v17 = vadd.f32 %v4206_v28, %v721_v19 }
 0x1b3   : > { %v4587_v27 = vmax.f32 %v762_v43, 0.0  ;;  %v763_v21 = vadd.f32 %v4206_v28, %v724_v55  ;;  %v1588_v30 = vsel %vm1561_vm7, %v1585_v13, %v1587_v0  ;;  %v1829_v54 = vmul.f32 %v4147_v61, %v1797_v15 }
 0x1b4   : > { %v761_v25 = vadd.f32 %v4206_v28, %v722_v32  ;;  %v1590_v58 = vsel %vm1561_vm7, %v1587_v0, %v5417_v50  ;;  %v4600_v60 = vmul.f32 %v4128_v49, %v4549_v20  ;;  %v1735_v4 = vmul.f32 %v4128_v49, %v789_v45 }
 0x1b5   : > { %v5425_v1 = vrot.slane %v4587_v27, 7  ;;  %v4604_v43 = vmax.f32 %v760_v17, 0.0  ;;  %v4607_v19 = vmax.f32 %v763_v21, 0.0  ;;  %v3618_v5 = vpop.f32.mrb[20].mxu0  ;;  %v1861_v0 = vadd.f32 %v1829_v54, %v4495_v51 }
 0x1b6   : > { %v4609_v55 = vmax.f32 %v761_v25, 0.0  ;;  %v4614_v36 = vmul.f32 %v4128_v49, %v4587_v27  ;;  %v727_v45 = vmul.f32 %v3618_v5, %v4194_v23  ;;  %v651_v7 = vpop.f32.mrb[21].mxu0  ;;  %v1702_v32 = vmul.f32 %v4135_v53, %v1670_v35 }
 0x1b7   : > { %v5418_v48 = vrot.slane %v4604_v43, 7  ;;  %v4622_v17 = vmul.f32 %v4128_v49, %v4604_v43  ;;  %v3619_v25 = vpop.f32.mrb[22].mxu0  ;;  %v4636_v5 = vmul.f32 %v4128_v49, %v4607_v19  ;;  %v725_v50 = vmul.f32 %v4194_v23, %v651_v7 }
 0x1b8   : > { %v5426_v51 = vrot.slane %v4609_v55, 7  ;;  %v766_v13 = vadd.f32 %v4206_v28, %v727_v45  ;;  %v654_v15 = vpop.f32.mrb[23].mxu0  ;;  %v4652_v62 = vpack.c.bf16 %v1861_v0, %v4521_v12  ;;  %v1703_v45 = vmul.f32 %v4135_v53, %v1491_v31 }
 0x1b9   : > { %v4631_v54 = vsel %vm1464_vm5, %v5420_v18, %v5418_v48  ;;  %v728_v48 = vmul.f32 %v3619_v25, %v4194_v23  ;;  %v726_v35 = vmul.f32 %v4194_v23, %v654_v15  ;;  %v1766_v18 = vadd.f32 %v1734_v29, %v1702_v32 }
 0x1ba   : > { %v4644_v21 = vsel %vm1464_vm5, %v5426_v51, %v5425_v1  ;;  %v4649_v42 = vmax.f32 %v766_v13, 0.0  ;;  %5488 = vst [vmem:[#allocation12_spill] sm:$0xff] %v4652_v62  ;;  %v764_v63 = vadd.f32 %v4206_v28, %v725_v50  ;;  %v1799_v7 = vmul.f32 %v4230_v41, %v1590_v58  ;;  %3653 = vmatmul.mubr.bf16.gmra.mrb[40].mxu0 %v4652_v62 }
 0x1bb   : > { %v767_v39 = vadd.f32 %v4206_v28, %v728_v48  ;;  %v765_v1 = vadd.f32 %v4206_v28, %v726_v35  ;;  %v4662_v13 = vmul.f32 %v4128_v49, %v4609_v55  ;;  %v1767_v31 = vadd.f32 %v1735_v4, %v1703_v45 }
 0x1bc   : > { %v4667_v50 = vmax.f32 %v764_v63, 0.0  ;;  %v1831_v58 = vmul.f32 %v4147_v61, %v1799_v7  ;;  %v5489_v35 = vrot.slane %v4549_v20, 7  ;;  %v5490_v25 = vrot.slane %v4523_v59, 7 }
 0x1bd   : > { %v4669_v0 = vmax.f32 %v767_v39, 0.0  ;;  %v4671_v48 = vmax.f32 %v765_v1, 0.0  ;;  %v3622_v41 = vpop.f32.mrb[24].mxu0  ;;  %v5491_v45 = vrot.slane %v4549_v20, 1  ;;  %v5492_v63 = vrot.slane %v4523_v59, 1 }
 0x1be   : > { %v731_v32 = vmul.f32 %v3622_v41, %v4194_v23  ;;  %v667_v15 = vpop.f32.mrb[25].mxu0  ;;  %v1495_v4 = vsel %vm1464_vm5, %v5490_v25, %v5489_v35  ;;  %v4687_v1 = vmul.f32 %v4128_v49, %v4649_v42  ;;  %v5434_v7 = vrot.slane %v4667_v50, 7 }
 0x1bf   : > { %v1592_v39 = vsel %vm1561_vm7, %v5492_v63, %v5491_v45  ;;  %v1830_v29 = vmul.f32 %v4147_v61, %v1588_v30  ;;  %v3623_v51 = vpop.f32.mrb[26].mxu0  ;;  %v4694_v25 = vmul.f32 %v4128_v49, %v4667_v50  ;;  %v5435_v45 = vrot.slane %v4671_v48, 7 }
 0x1c0   : > { %v670_v63 = vpop.f32.mrb[27].mxu0  ;;  %v5493_v12 = vrot.slane %v4607_v19, 7  ;;  %v4708_v30 = vmul.f32 %v4128_v49, %v4669_v0  ;;  %v1863_v38 = vadd.f32 %v1831_v58, %v1767_v31  ;;  %v5494_v35 = vrot.slane %v4649_v42, 7 }
 0x1c1   : > { %v1862_v62 = vadd.f32 %v1830_v29, %v1766_v18  ;;  %v770_v8 = vadd.f32 %v4206_v28, %v731_v32  ;;  %v729_v52 = vmul.f32 %v4194_v23, %v667_v15  ;;  %v730_v47 = vmul.f32 %v4194_v23, %v670_v63 }
 0x1c2   : > { %v4704_v41 = vsel %vm1464_vm5, %v5493_v12, %v5434_v7  ;;  %v4715_v59 = vsel %vm1464_vm5, %v5435_v45, %v5494_v35  ;;  %v732_v12 = vmul.f32 %v3623_v51, %v4194_v23  ;;  %v5496_v18 = vrot.slane %v4604_v43, 1 }
 0x1c3   : > { %v4720_v7 = vpack.c.bf16 %v1863_v38, %v1862_v62  ;;  %v5497_v31 = vrot.slane %v4549_v20, 1  ;;  %v1672_v58 = vmul.f32 %v4237_v46, %v4582_v22  ;;  %v4730_v35 = vmax.f32 %v770_v8, 0.0 }
 0x1c4   : > { %v768_v32 = vadd.f32 %v4206_v28, %v729_v52  ;;  %v771_v15 = vadd.f32 %v4206_v28, %v732_v12  ;;  %v1705_v38 = vmul.f32 %v4135_v53, %v1495_v4  ;;  %v769_v51 = vadd.f32 %v4206_v28, %v730_v47 }
 0x1c5   : > { %5495 = vst [vmem:[#allocation13_spill] sm:$0xff] %v4720_v7  ;;  %v1594_v29 = vsel %vm1561_vm7, %v5497_v31, %v5496_v18  ;;  %3656 = vmatprep.mubr.bf16.mxu0 %v4720_v7  ;;  %v1704_v20 = vmul.f32 %v4135_v53, %v1672_v58  ;;  %v3626_v18 = vpop.f32.mrb[28].mxu0  ;;  %v4742_v46 = vmul.f32 %v4128_v49, %v4671_v48  ;;  %v5439_v52 = vrot.slane %v4730_v35, 7 }
 0x1c6   : > { %v1801_v63 = vmul.f32 %v4256_v3, %v1594_v29  ;;  %v4745_v8 = vmax.f32 %v768_v32, 0.0  ;;  %v1832_v22 = vmul.f32 %v4147_v61, %v1592_v39  ;;  %v683_v4 = vpop.f32.mrb[29].mxu0  ;;  %v4748_v12 = vmax.f32 %v771_v15, 0.0 }
 0x1c7   : > { %v4750_v31 = vmax.f32 %v769_v51, 0.0  ;;  %v1768_v47 = vadd.f32 %v4564_v24, %v1704_v20  ;;  %v1769_v3 = vadd.f32 %v4600_v60, %v1705_v38  ;;  %v3627_v29 = vpop.f32.mrb[30].mxu0  ;;  %v4757_v62 = vmul.f32 %v4128_v49, %v4730_v35 }
 0x1c8   : > { %v5438_v32 = vrot.slane %v4745_v8, 7  ;;  %v1833_v39 = vmul.f32 %v4147_v61, %v1801_v63  ;;  %v686_v45 = vpop.f32.mrb[31].mxu0  ;;  %v4764_v51 = vmul.f32 %v4128_v49, %v4745_v8  ;;  %v5498_v38 = vrot.slane %v4669_v0, 7 }
 0x1c9   : > { %v5440_v60 = vrot.slane %v4750_v31, 7  ;;  %v4778_v58 = vmul.f32 %v4128_v49, %v4748_v12  ;;  %v1864_v15 = vadd.f32 %v1832_v22, %v1768_v47  ;;  %v5499_v57 = vrot.slane %v4609_v55, 7 }
 0x1ca   : > { %v4773_v20 = vsel %vm1464_vm5, %v5498_v38, %v5438_v32  ;;  %v1865_v7 = vadd.f32 %v1833_v39, %v1769_v3  ;;  %v5500_v38 = vrot.slane %v4604_v43, 7  ;;  %v5501_v63 = vrot.slane %v4609_v55, 1 }
 0x1cb   : > { %v4785_v24 = vsel %vm1464_vm5, %v5440_v60, %v5439_v52  ;;  %v5502_v37 = vrot.slane %v4604_v43, 1  ;;  %v5503_v47 = vrot.slane %v4587_v27, 1  ;;  %v1674_v3 = vmul.f32 %v4261_v6, %v4631_v54 }
 0x1cc   : > { %v1499_v32 = vsel %vm1464_vm5, %v5500_v38, %v5499_v57  ;;  %v5504_v16 = vmov %v5501_v63  ;;  %v4806_v57 = vpack.c.bf16 %v1865_v7, %v1864_v15  ;;  %v735_v43 = vmul.f32 %v3626_v18, %v4194_v23 }
 0x1cd   : > { %v1596_v22 = vsel %vm1561_vm7, %v5502_v37, %v5501_v63  ;;  %v1598_v52 = vsel %vm1561_vm7, %v5504_v16, %v5503_v47  ;;  %v1707_v39 = vmul.f32 %v4135_v53, %v1499_v32  ;;  %v733_v37 = vmul.f32 %v4194_v23, %v683_v4 }
 0x1ce   : > { %v1834_v60 = vmul.f32 %v4147_v61, %v1596_v22  ;;  %v1803_v38 = vmul.f32 %v4266_v9, %v1598_v52  ;;  %v1706_v63 = vmul.f32 %v4135_v53, %v1674_v3  ;;  %v736_v16 = vmul.f32 %v3627_v29, %v4194_v23  ;;  %3657 = vmatmul.mubr.bf16.gmra.mrb[44].mxu0 %v4806_v57 }
 0x1cf   : > { %v1771_v55 = vadd.f32 %v4662_v13, %v1707_v39  ;;  %v734_v6 = vmul.f32 %v4194_v23, %v686_v45  ;;  %v774_v7 = vadd.f32 %v4206_v28, %v735_v43  ;;  %v772_v9 = vadd.f32 %v4206_v28, %v733_v37 }
 0x1d0   : > { %v1835_v54 = vmul.f32 %v4147_v61, %v1803_v38  ;;  %v5505_v18 = vrot.slane %v4607_v19, 7  ;;  %v5506_v52 = vrot.slane %v4587_v27, 7  ;;  %v1770_v13 = vadd.f32 %v4622_v17, %v1706_v63 }
 0x1d1   : > { %v775_v29 = vadd.f32 %v4206_v28, %v736_v16  ;;  %v773_v23 = vadd.f32 %v4206_v28, %v734_v6  ;;  %v5507_v45 = vrot.slane %v4607_v19, 1  ;;  %v5508_v32 = vmov %v5503_v47 }
 0x1d2   : > { %v1503_v4 = vsel %vm1464_vm5, %v5506_v52, %v5505_v18  ;;  %v1867_v22 = vadd.f32 %v1835_v54, %v1771_v55  ;;  %v4832_v47 = vmax.f32 %v774_v7, 0.0  ;;  %v4834_v3 = vmax.f32 %v772_v9, 0.0 }
 0x1d3   : > { %v1600_v15 = vsel %vm1561_vm7, %v5508_v32, %v5507_v45  ;;  %v5509_v39 = vrot.slane %v4667_v50, 1  ;;  %v5510_v38 = vmov %v5507_v45  ;;  %v1866_v43 = vadd.f32 %v1834_v60, %v1770_v13 }
 0x1d4   : > { %v4841_v37 = vmax.f32 %v775_v29, 0.0  ;;  %v4843_v28 = vmax.f32 %v773_v23, 0.0  ;;  %v1676_v27 = vmul.f32 %v4269_v10, %v4644_v21  ;;  %v1611_v63 = vrot.slane %v4750_v31, 1 }
 0x1d5   : > { %v1602_v17 = vsel %vm1561_vm7, %v5510_v38, %v5509_v39  ;;  %v4850_v55 = vmul.f32 %v4128_v49, %v4750_v31  ;;  %v5442_v16 = vrot.slane %v4832_v47, 7  ;;  %v1520_v19 = vrot.slane %v4834_v3, 7 }
 0x1d6   : > { %v4854_v6 = vpack.c.bf16 %v1867_v22, %v1866_v43  ;;  %v1617_v54 = vrot.slane %v4834_v3, 1  ;;  %v4860_v7 = vmul.f32 %v4128_v49, %v4834_v3  ;;  %v5511_v10 = vrot.slane %v4748_v12, 7 }
 0x1d7   : > { %v5441_v18 = vrot.slane %v4841_v37, 1  ;;  %v1522_v52 = vrot.slane %v4843_v28, 7  ;;  %v1619_v13 = vrot.slane %v4843_v28, 1  ;;  %v4876_v29 = vmul.f32 %v4128_v49, %v4843_v28 }
 0x1d8   : > { %v4867_v21 = vsel %vm1464_vm5, %v5511_v10, %v1520_v19  ;;  %3660 = vmatprep.mubr.bf16.mxu1 %v4854_v6  ;;  %v1708_v23 = vmul.f32 %v4135_v53, %v1676_v27  ;;  %v1709_v45 = vmul.f32 %v4135_v53, %v1503_v4  ;;  %v1805_v39 = vmul.f32 %v4272_v11, %v1602_v17 }
 0x1d9   : > { %v4883_v32 = vsel %vm1561_vm7, %v5441_v18, 0.0  ;;  %v4890_v22 = vsel %vm1464_vm5, %v1522_v52, %v5442_v16  ;;  %v1836_v38 = vmul.f32 %v4147_v61, %v1600_v15  ;;  %v5512_v27 = vrot.slane %v4671_v48, 7 }
 0x1da   : > { %v1772_v43 = vadd.f32 %v4614_v36, %v1708_v23  ;;  %v1773_v4 = vadd.f32 %v4636_v5, %v1709_v45  ;;  %v5513_v10 = vrot.slane %v4667_v50, 7  ;;  %v5514_v9 = vrot.slane %v4671_v48, 1 }
 0x1db   : > { %v5515_v60 = vrot.slane %v4667_v50, 1  ;;  %v1837_v11 = vmul.f32 %v4147_v61, %v1805_v39  ;;  %v5516_v15 = vrot.slane %v4649_v42, 1  ;;  %v1678_v17 = vmul.f32 %v4275_v14, %v4704_v41 }
 0x1dc   : > { %v1507_v18 = vsel %vm1464_vm5, %v5513_v10, %v5512_v27  ;;  %v5517_v36 = vmov %v5514_v9  ;;  %v1868_v45 = vadd.f32 %v1836_v38, %v1772_v43  ;;  %v5520_v14 = vrot.slane %v4669_v0, 1 }
 0x1dd   : > { %v1604_v16 = vsel %vm1561_vm7, %v5515_v60, %v5514_v9  ;;  %v1606_v5 = vsel %vm1561_vm7, %v5517_v36, %v5516_v15  ;;  %v1711_v23 = vmul.f32 %v4135_v53, %v1507_v18  ;;  %v5518_v60 = vrot.slane %v4669_v0, 7 }
 0x1de   : > { %v1807_v27 = vmul.f32 %v4328_v40, %v1606_v5  ;;  %v1838_v50 = vmul.f32 %v4147_v61, %v1604_v16  ;;  %v5519_v9 = vrot.slane %v4649_v42, 7  ;;  %v1869_v10 = vadd.f32 %v1837_v11, %v1773_v4 }
 0x1df   : > { %v1710_v48 = vmul.f32 %v4135_v53, %v1678_v17  ;;  %v1775_v15 = vadd.f32 %v4742_v46, %v1711_v23  ;;  %v5521_v41 = vrot.slane %v4649_v42, 1  ;;  %v5522_v16 = vrot.slane %v4745_v8, 1  ;;  %v3927_v42 = vld [vmem:[%s5410_s4 + $0x8] sm:$0xff]  }
 0x1e0   : > { %v1511_v39 = vsel %vm1464_vm5, %v5519_v9, %v5518_v60  ;;  %v1839_v40 = vmul.f32 %v4147_v61, %v1807_v27  ;;  %v5523_v38 = vmov %v5520_v14  ;;  %v1680_v4 = vmul.f32 %v4337_v44, %v4715_v59 }
 0x1e1   : > { %v1608_v18 = vsel %vm1561_vm7, %v5521_v41, %v5520_v14  ;;  %v1610_v43 = vsel %vm1561_vm7, %v5523_v38, %v5522_v16  ;;  %v1713_v11 = vmul.f32 %v4135_v53, %v1511_v39  ;;  %v4938_v46 = vpack.c.bf16 %v1869_v10, %v1868_v45 }
 0x1e2   : > { %v1774_v36 = vadd.f32 %v4694_v25, %v1710_v48  ;;  %v1809_v5 = vmul.f32 %v4424_v56, %v1610_v43  ;;  %v1840_v17 = vmul.f32 %v4147_v61, %v1608_v18  ;;  %v1871_v0 = vadd.f32 %v1839_v40, %v1775_v15 }
 0x1e3   : > { %v1712_v23 = vmul.f32 %v4135_v53, %v1680_v4  ;;  %v1777_v27 = vadd.f32 %v4708_v30, %v1713_v11  ;;  %v5524_v44 = vrot.slane %v4750_v31, 7  ;;  %v5525_v59 = vrot.slane %v4745_v8, 7  ;;  %3661 = vmatmul.mubr.bf16.vlgmr.msra.gmra.mrb[0].mxu1 %v4938_v46  ;;  %v3950_v30 = vld [vmem:[%s5410_s4] sm:$0xff]  }
 0x1e4   : > { %v1870_v25 = vadd.f32 %v1838_v50, %v1774_v36  ;;  %v1841_v60 = vmul.f32 %v4147_v61, %v1809_v5  ;;  %v5526_v56 = vmov %v5522_v16  ;;  %v5527_v39 = vrot.slane %v4730_v35, 1  ;;  %3677 = vmatpush3.bf16.msra.mxu1 %v3950_v30 }
 0x1e5   : > { %v1515_v45 = vsel %vm1464_vm5, %v5525_v59, %v5524_v44  ;;  %v1612_v9 = vsel %vm1561_vm7, %v5526_v56, %v1611_v63  ;;  %v1776_v31 = vadd.f32 %v4687_v1, %v1712_v23  ;;  %v1682_v50 = vmul.f32 %v4431_v34, %v4773_v20  ;;  %3678 = vmatprep.subr.bf16.mxu1 %v3927_v42 }
 0x1e6   : > { %v1614_v10 = vsel %vm1561_vm7, %v1611_v63, %v5527_v39  ;;  %v1715_v48 = vmul.f32 %v4135_v53, %v1515_v45  ;;  %v4969_v15 = vpack.c.bf16 %v1871_v0, %v1870_v25  ;;  %v3928_v63 = vld [vmem:[%s5410_s4 + $0x10] sm:$0xff]   ;;  %v1873_v14 = vadd.f32 %v1841_v60, %v1777_v27  ;;  %v5535_v60 = vld [vmem:[#allocation10_spill] sm:$0xff] }
 0x1e7   : > { %v1811_v8 = vmul.f32 %v4436_v2, %v1614_v10  ;;  %v1842_v41 = vmul.f32 %v4147_v61, %v1612_v9  ;;  %v5528_v18 = vrot.slane %v4748_v12, 7  ;;  %v5529_v1 = vrot.slane %v4730_v35, 7 }
 0x1e8   : > { %v1872_v20 = vadd.f32 %v1840_v17, %v1776_v31  ;;  %v1714_v40 = vmul.f32 %v4135_v53, %v1682_v50  ;;  %v1779_v2 = vadd.f32 %v4850_v55, %v1715_v48  ;;  %3664 = vmatprep.mubr.bf16.mxu1 %v4969_v15  ;;  %v5530_v38 = vrot.slane %v4748_v12, 1  ;;  %3679 = vmatpush3.bf16.msra.mxu1 %v3927_v42  ;;  %v3929_v12 = vld [vmem:[%s5410_s4 + $0x18] sm:$0xff]  }
 0x1e9   : > { %v1519_v34 = vsel %vm1464_vm5, %v5529_v1, %v5528_v18  ;;  %v1843_v16 = vmul.f32 %v4147_v61, %v1811_v8  ;;  %v5531_v43 = vmov %v5527_v39  ;;  %v1684_v5 = vmul.f32 %v4529_v33, %v4785_v24  ;;  %3680 = vmatprep.subr.bf16.mxu1 %v3928_v63  ;;  %v5541_v18 = vld [vmem:[#allocation9_spill] sm:$0xff] }
 0x1ea   : > { %v1616_v4 = vsel %vm1561_vm7, %v5531_v43, %v5530_v38  ;;  %v5532_v11 = vmov %v5530_v38  ;;  %v1717_v55 = vmul.f32 %v4135_v53, %v1519_v34  ;;  %v4997_v17 = vpack.c.bf16 %v1873_v14, %v1872_v20 }
 0x1eb   : > { %v1618_v36 = vsel %vm1561_vm7, %v5532_v11, %v1617_v54  ;;  %v1778_v0 = vadd.f32 %v4764_v51, %v1714_v40  ;;  %v1875_v23 = vadd.f32 %v1843_v16, %v1779_v2  ;;  %v1716_v27 = vmul.f32 %v4135_v53, %v1684_v5  ;;  %v3934_v5 = vld [vmem:[%s5410_s4 + $0x80] sm:$0xff]  }
 0x1ec   : > { %v1813_v35 = vmul.f32 %v4534_v26, %v1618_v36  ;;  %v1781_v44 = vadd.f32 %v4778_v58, %v1717_v55  ;;  %v1844_v33 = vmul.f32 %v4147_v61, %v1616_v4  ;;  %v1523_v51 = vsel %vm1464_vm5, %v1520_v19, %v1522_v52  ;;  %3665 = vmatmul.mubr.bf16.gmra.mrb[4].mxu1 %v4997_v17  ;;  %v5534_v19 = vld [vmem:[#allocation8_spill] sm:$0xff] }
 0x1ed   : > { %v1874_v24 = vadd.f32 %v1842_v41, %v1778_v0  ;;  %v1620_v42 = vsel %vm1561_vm7, %v1617_v54, %v1619_v13  ;;  %v5533_v59 = vrot.slane %v4832_v47, 1  ;;  %v1780_v45 = vadd.f32 %v4757_v62, %v1716_v27  ;;  %3681 = vmatpush3.bf16.msra.mxu1 %v3928_v63  ;;  %v5540_v63 = vld [vmem:[#allocation11_spill] sm:$0xff]  ;;  %v3935_v55 = vld [vmem:[%s5410_s4 + $0x88] sm:$0xff]   ;;  %v5544_v27 = vld [vmem:[#allocation5_spill] sm:$0xff] }
 0x1ee   : > { %v1845_v26 = vmul.f32 %v4147_v61, %v1813_v35  ;;  %v1686_v52 = vmul.f32 %v5534_v19, %v4867_v21  ;;  %v1719_v25 = vmul.f32 %v4135_v53, %v1523_v51  ;;  %v1753_v3 = vmul.f32 %v4128_v49, %v4841_v37  ;;  %3682 = vmatprep.subr.bf16.mxu1 %v3929_v12  ;;  %v3930_v21 = vld [vmem:[%s5410_s4 + $0x20] sm:$0xff]   ;;  %v3936_v35 = vld [vmem:[%s5410_s4 + $0x90] sm:$0xff]   ;;  %v3939_v51 = vld [vmem:[%s5410_s4 + $0xa8] sm:$0xff]  }
 0x1ef   : > { %v1622_v58 = vsel %vm1561_vm7, %v1619_v13, %v5533_v59  ;;  %v5031_v54 = vpack.c.bf16 %v1875_v23, %v1874_v24  ;;  %v5536_v13 = vrot.slane %v4841_v37, 7  ;;  %v5537_v9 = vrot.slane %v4832_v47, 7  ;;  %v5542_v0 = vld [vmem:[#allocation3_spill] sm:$0xff]  ;;  %v5543_v23 = vld [vmem:[#allocation4_spill] sm:$0xff] }
 0x1f0   : > { %v1815_v56 = vmul.f32 %v5535_v60, %v1622_v58  ;;  %v1877_v28 = vadd.f32 %v1845_v26, %v1781_v44  ;;  %v1876_v39 = vadd.f32 %v1844_v33, %v1780_v45  ;;  %v1718_v10 = vmul.f32 %v4135_v53, %v1686_v52  ;;  %v5545_v44 = vld [vmem:[#allocation6_spill] sm:$0xff]  ;;  %v3938_v33 = vld [vmem:[%s5410_s4 + $0xa0] sm:$0xff]   ;;  %v5547_v26 = vld [vmem:[#allocation12_spill] sm:$0xff] }
 0x1f1   : > { %v1527_v62 = vsel %vm1464_vm5, %v5537_v9, %v5536_v13  ;;  %v1783_v30 = vadd.f32 %v4876_v29, %v1719_v25  ;;  %3668 = vmatprep.mubr.bf16.mxu1 %v5031_v54  ;;  %v5538_v50 = vrot.slane %v4841_v37, 1  ;;  %v5539_v48 = vmov %v5533_v59  ;;  %3683 = vmatpush3.bf16.msra.mxu1 %v3929_v12  ;;  %v3937_v12 = vld [vmem:[%s5410_s4 + $0x98] sm:$0xff]   ;;  %v5546_v24 = vld [vmem:[#allocation7_spill] sm:$0xff]  ;;  %v5548_v58 = vld [vmem:[#allocation13_spill] sm:$0xff] }
 0x1f2   : > { %v1847_v31 = vmul.f32 %v4147_v61, %v1815_v56  ;;  %v1688_v14 = vmul.f32 %v5540_v63, %v4890_v22  ;;  %v1721_v41 = vmul.f32 %v4135_v53, %v1527_v62  ;;  %v1817_v1 = vmul.f32 %v5541_v18, %v4883_v32  ;;  %3684 = vmatprep.subr.bf16.mxu1 %v3930_v21  ;;  %v3931_v32 = vld [vmem:[%s5410_s4 + $0x28] sm:$0xff]   ;;  %v3941_v59 = vld [vmem:[%s5410_s4 + $0xb8] sm:$0xff]   ;;  %v3942_v45 = vld [vmem:[%s5413_s7] sm:$0xff]  }
 0x1f3   : > { %v1624_v8 = vsel %vm1561_vm7, %v5539_v48, %v5538_v50  ;;  %v5055_v34 = vpack.c.bf16 %v1877_v28, %v1876_v39  ;;  %v1782_v29 = vadd.f32 %v4860_v7, %v1718_v10  ;;  %v1846_v20 = vmul.f32 %v4147_v61, %v1620_v42  ;;  %v3940_v42 = vld [vmem:[%s5410_s4 + $0xb0] sm:$0xff]   ;;  %v3943_v19 = vld [vmem:[%s5413_s7 + $0x8] sm:$0xff]   ;;  %3772 = vmatprep.subr.bf16.mxu0 %v3942_v45  ;;  %v3945_v25 = vld [vmem:[%s5413_s7 + $0x18] sm:$0xff]  }
 0x1f4   : > { %v1879_v40 = vadd.f32 %v1847_v31, %v1783_v30  ;;  %v1752_v37 = vmul.f32 %v4128_v49, %v4832_v47  ;;  %v1720_v2 = vmul.f32 %v4135_v53, %v1688_v14  ;;  %v1785_v16 = vadd.f32 %v1753_v3, %v1721_v41  ;;  %v3932_v53 = vld [vmem:[%s5410_s4 + $0x30] sm:$0xff]   ;;  %3773 = vmatpush3.bf16.msra.mxu0 %v3942_v45  ;;  %v3946_v60 = vld [vmem:[%s5413_s7 + $0x20] sm:$0xff]   ;;  %v3949_v30 = vld [vmem:[%s5413_s7 + $0x38] sm:$0xff]  }
 0x1f5   : > { %v1849_v22 = vmul.f32 %v4147_v61, %v1817_v1  ;;  %v1878_v38 = vadd.f32 %v1846_v20, %v1782_v29  ;;  %v1848_v7 = vmul.f32 %v4147_v61, %v1624_v8  ;;  %3669 = vmatmul.mubr.bf16.gmra.mrb[8].mxu1 %v5055_v34  ;;  %v3933_v61 = vld [vmem:[%s5410_s4 + $0x38] sm:$0xff]   ;;  %v3960_v36 = vmov 0   ;;  %3774 = vmatprep.subr.bf16.mxu0 %v3943_v19  ;;  %v3944_v52 = vld [vmem:[%s5413_s7 + $0x10] sm:$0xff]   ;;  %v5177_v63 = vld [vmem:[%s5411_s5] ss:$0 sm:$0xff] }
 0x1f6   : > { %v1784_v43 = vadd.f32 %v1752_v37, %v1720_v2  ;;  %3685 = vmatpush3.bf16.msra.mxu1 %v3930_v21  ;;  %v3947_v21 = vld [vmem:[%s5413_s7 + $0x28] sm:$0xff]   ;;  %v3948_v39 = vld [vmem:[%s5413_s7 + $0x30] sm:$0xff]   ;;  %v5182_v18 = vld [vmem:[%s5412_s6] ss:$0 sm:$0xff] }
 0x1f7   : > { %v1881_v4 = vadd.f32 %v1849_v22, %v1785_v16  ;;  %v5068_v11 = vpack.c.bf16 %v1879_v40, %v1878_v38  ;;  %3686 = vmatprep.subr.bf16.mxu1 %v3931_v32 }
 0x1f8   : > { %v1880_v49 = vadd.f32 %v1848_v7, %v1784_v43  ;;  %3775 = vmatpush3.bf16.msra.mxu0 %v3943_v19 }
 0x1f9   : > { %3672 = vmatprep.mubr.bf16.mxu1 %v5068_v11  ;;  %3776 = vmatprep.subr.bf16.mxu0 %v3944_v52 }
 0x1fa   : > { %v5074_v47 = vpack.c.bf16 %v1881_v4, %v1880_v49  ;;  %3687 = vmatpush3.bf16.msra.mxu1 %v3931_v32 }
 0x1fb   : > { %3688 = vmatprep.subr.bf16.mxu1 %v3932_v53 }
 0x1fc   : > { %3777 = vmatpush3.bf16.msra.mxu0 %v3944_v52 }
 0x1fd   : > { %3673 = vmatmul.mubr.bf16.gmra.mrb[12].mxu1 %v5074_v47  ;;  %3778 = vmatprep.subr.bf16.mxu0 %v3945_v25 }
 0x1fe   : > { %3689 = vmatpush3.bf16.msra.mxu1 %v3932_v53  ;;  %3692 = vmatprep.mubr.bf16.mxu1 %v3960_v36 }
 0x1ff   : > { %3690 = vmatprep.subr.bf16.mxu1 %v3933_v61 }
 0x200   : > { %3779 = vmatpush3.bf16.msra.mxu0 %v3945_v25 }
 0x201   : > { %3780 = vmatprep.subr.bf16.mxu0 %v3946_v60 }
 0x202   : > { %3691 = vmatpush3.bf16.msra.mxu1 %v3933_v61 }
 0x203   : > { %3724 = vmatprep.subr.bf16.mxu1 %v3934_v5 }
 0x204   : > { %3781 = vmatpush3.bf16.msra.mxu0 %v3946_v60 }
 0x205   : > { %3693 = vmatmul.mubr.bf16.vlgmr.msra.gmra.mrb[16].mxu1 %v5542_v0  ;;  %3782 = vmatprep.subr.bf16.mxu0 %v3947_v21 }
 0x206   : > { %3725 = vmatpush3.bf16.msra.mxu1 %v3934_v5  ;;  %3696 = vmatprep.mubr.bf16.mxu1 %v5543_v23 }
 0x207   : > { %3726 = vmatprep.subr.bf16.mxu1 %v3935_v55 }
 0x208   : > { %3783 = vmatpush3.bf16.msra.mxu0 %v3947_v21 }
 0x209   : > { %3784 = vmatprep.subr.bf16.mxu0 %v3948_v39 }
 0x20a   : > { %3727 = vmatpush3.bf16.msra.mxu1 %v3935_v55 }
 0x20b   : > { %3728 = vmatprep.subr.bf16.mxu1 %v3936_v35 }
 0x20c   : > { %3785 = vmatpush3.bf16.msra.mxu0 %v3948_v39 }
 0x20d   : > { %3697 = vmatmul.mubr.bf16.gmra.mrb[20].mxu1 %v5544_v27  ;;  %3786 = vmatprep.subr.bf16.mxu0 %v3949_v30 }
 0x20e   : > { %3700 = vmatprep.mubr.bf16.mxu1 %v5545_v44  ;;  %3729 = vmatpush3.bf16.msra.mxu1 %v3936_v35 }
 0x20f   : > { %3730 = vmatprep.subr.bf16.mxu1 %v3937_v12 }
 0x210   : > { %3787 = vmatpush3.bf16.msra.mxu0 %v3949_v30 }
 0x212   : > { %3731 = vmatpush3.bf16.msra.mxu1 %v3937_v12 }
 0x213   : > { %3732 = vmatprep.subr.bf16.mxu1 %v3938_v33 }
 0x215   : > { %3701 = vmatmul.mubr.bf16.gmra.mrb[24].mxu1 %v5546_v24 }
 0x216   : > { %3704 = vmatprep.mubr.bf16.mxu1 %v5547_v26  ;;  %3733 = vmatpush3.bf16.msra.mxu1 %v3938_v33 }
 0x217   : > { %3734 = vmatprep.subr.bf16.mxu1 %v3939_v51 }
 0x21a   : > { %3735 = vmatpush3.bf16.msra.mxu1 %v3939_v51 }
 0x21b   : > { %3736 = vmatprep.subr.bf16.mxu1 %v3940_v42 }
 0x21d   : > { %3705 = vmatmul.mubr.bf16.gmra.mrb[28].mxu1 %v5548_v58 }
 0x21e   : > { %3708 = vmatprep.mubr.bf16.mxu1 %v4806_v57  ;;  %3737 = vmatpush3.bf16.msra.mxu1 %v3940_v42 }
 0x21f   : > { %3738 = vmatprep.subr.bf16.mxu1 %v3941_v59 }
 0x222   : > { %3739 = vmatpush3.bf16.msra.mxu1 %v3941_v59 }
 0x225   : > { %3709 = vmatmul.mubr.bf16.gmra.mrb[0].mxu1 %v4854_v6 }
 0x226   : > { %3712 = vmatprep.mubr.bf16.mxu1 %v4938_v46 }
 0x22d   : > { %3713 = vmatmul.mubr.bf16.gmra.mrb[4].mxu1 %v4969_v15 }
 0x22e   : > { %3716 = vmatprep.mubr.bf16.mxu1 %v4997_v17 }
 0x235   : > { %3717 = vmatmul.mubr.bf16.gmra.mrb[8].mxu1 %v5031_v54 }
 0x236   : > { %3720 = vmatprep.mubr.bf16.mxu1 %v5055_v34 }
 0x23d   : > { %3721 = vmatmul.mubr.bf16.gmra.mrb[12].mxu1 %v5068_v11 }
 0x23e   : > { %3740 = vmatprep.mubr.bf16.mxu1 %v5543_v23 }
 0x245   : > { %3741 = vmatmul.mubr.bf16.vlgmr.msra.gmra.mrb[16].mxu1 %v5544_v27 }
 0x246   : > { %3744 = vmatprep.mubr.bf16.mxu1 %v5545_v44 }
 0x24d   : > { %3745 = vmatmul.mubr.bf16.gmra.mrb[20].mxu1 %v5546_v24 }
 0x24e   : > { %3748 = vmatprep.mubr.bf16.mxu1 %v5547_v26 }
 0x255   : > { %3749 = vmatmul.mubr.bf16.gmra.mrb[24].mxu1 %v5548_v58 }
 0x256   : > { %3752 = vmatprep.mubr.bf16.mxu1 %v4806_v57 }
 0x25d   : > { %3753 = vmatmul.mubr.bf16.gmra.mrb[28].mxu1 %v4854_v6 }
 0x25e   : > { %3756 = vmatprep.mubr.bf16.mxu1 %v4938_v46 }
 0x265   : > { %3757 = vmatmul.mubr.bf16.gmra.mrb[0].mxu1 %v4969_v15 }
 0x266   : > { %3760 = vmatprep.mubr.bf16.mxu1 %v4997_v17 }
 0x26b   : > { %v3646_v56 = vpop.f32.mrb[32].mxu0 }
 0x26c   : > { %v2048_v3 = vpop.f32.mrb[33].mxu0 }
 0x26d   : > { %3761 = vmatmul.mubr.bf16.gmra.mrb[4].mxu1 %v5031_v54  ;;  %v3647_v28 = vpop.f32.mrb[34].mxu0 }
 0x26e   : > { %3764 = vmatprep.mubr.bf16.mxu1 %v5055_v34  ;;  %v2051_v13 = vpop.f32.mrb[35].mxu0 }
 0x275   : > { %3765 = vmatmul.mubr.bf16.gmra.mrb[8].mxu1 %v5068_v11 }
 0x276   : > { %3768 = vmatprep.mubr.bf16.mxu1 %v5074_v47 }
 0x27c   : > { %v3650_v57 = vpop.f32.mrb[36].mxu0 }
 0x27d   : > { %3769 = vmatmul.mubr.bf16.gmra.mrb[12].mxu1 %v3960_v36  ;;  %v2064_v6 = vpop.f32.mrb[37].mxu0 }
 0x27e   : > { %v3651_v46 = vpop.f32.mrb[38].mxu0 }
 0x27f   : > { %v2067_v15 = vpop.f32.mrb[39].mxu0 }
 0x28d   : > { %v3654_v9 = vpop.f32.mrb[40].mxu0 }
 0x28e   : > { %v5151_v17 = vpop.f32.mrb[41].mxu0 }
 0x28f   : > { %v5153_v54 = vpop.f32.mrb[42].mxu0 }
 0x290   : > { %v5155_v62 = vpop.f32.mrb[43].mxu0 }
 0x2a1   : > { %v5163_v10 = vpop.f32.mrb[44].mxu0 }
 0x2a2   : > { %v5168_v31 = vpop.f32.mrb[45].mxu0 }
 0x2a3   : > { %v5170_v50 = vpop.f32.mrb[46].mxu0 }
 0x2a4   : > { %v5172_v48 = vpop.f32.mrb[47].mxu0 }
 0x318   : > { %v3742_v8 = vpop.f32.mrb[16].mxu1 }
 0x319   : > { %v3836_v14 = vadd.f32 %v3742_v8, %v3646_v56  ;;  %v2499_v41 = vpop.f32.mrb[17].mxu1 }
 0x31a   : > { %v3837_v1 = vadd.f32 %v2499_v41, %v2048_v3  ;;  %v3743_v34 = vpop.f32.mrb[18].mxu1 }
 0x31b   : > { %v2667_v29 = vmul.f32 %v3836_v14, %v5177_v63  ;;  %v3838_v20 = vadd.f32 %v3743_v34, %v3647_v28  ;;  %v2502_v40 = vpop.f32.mrb[19].mxu1 }
 0x31c   : > { %v2665_v37 = vmul.f32 %v3837_v1, %v5177_v63  ;;  %v3839_v2 = vadd.f32 %v2502_v40, %v2051_v13 }
 0x31d   : > { %v2706_v16 = vadd.f32 %v5182_v18, %v2667_v29  ;;  %v2668_v22 = vmul.f32 %v3838_v20, %v5177_v63 }
 0x31e   : > { %v2704_v38 = vadd.f32 %v5182_v18, %v2665_v37  ;;  %v2666_v32 = vmul.f32 %v3839_v2, %v5177_v63 }
 0x31f   : > { %v2707_v43 = vadd.f32 %v5182_v18, %v2668_v22  ;;  %v2738_v11 = vmax.f32 %v2706_v16, 0.0 }
 0x320   : > { %v2705_v7 = vadd.f32 %v5182_v18, %v2666_v32  ;;  %v3746_v4 = vpop.f32.mrb[20].mxu1  ;;  %v2736_v61 = vmax.f32 %v2704_v38, 0.0 }
 0x321   : > { %v2739_v49 = vmax.f32 %v2707_v43, 0.0  ;;  %v3840_v53 = vadd.f32 %v3746_v4, %v3650_v57  ;;  %v2515_v47 = vpop.f32.mrb[21].mxu1 }
 0x322   : > { %v2737_v36 = vmax.f32 %v2705_v7, 0.0  ;;  %v3841_v5 = vadd.f32 %v2515_v47, %v2064_v6  ;;  %v3747_v55 = vpop.f32.mrb[22].mxu1 }
 0x323   : > { %v2769_v0 = vpack.c.bf16 %v2739_v49, %v2738_v11  ;;  %v2671_v23 = vmul.f32 %v3840_v53, %v5177_v63  ;;  %v3842_v35 = vadd.f32 %v3747_v55, %v3651_v46  ;;  %v2518_v12 = vpop.f32.mrb[23].mxu1 }
 0x324   : > { %v2669_v27 = vmul.f32 %v3841_v5, %v5177_v63  ;;  %v3843_v44 = vadd.f32 %v2518_v12, %v2067_v15  ;;  %v2768_v33 = vpack.c.bf16 %v2737_v36, %v2736_v61 }
 0x325   : > { %v2710_v51 = vadd.f32 %v5182_v18, %v2671_v23  ;;  %v2672_v24 = vmul.f32 %v3842_v35, %v5177_v63 }
 0x326   : > { %v2708_v26 = vadd.f32 %v5182_v18, %v2669_v27  ;;  %v2670_v42 = vmul.f32 %v3843_v44, %v5177_v63  ;;  %3788 = vmatprep.mubr.bf16.mxu0 %v2768_v33 }
 0x327   : > { %v2711_v59 = vadd.f32 %v5182_v18, %v2672_v24  ;;  %3789 = vmatmul.mubr.bf16.vlgmr.msra.gmra.mrb[48].mxu0 %v2769_v0  ;;  %v2742_v19 = vmax.f32 %v2710_v51, 0.0 }
 0x328   : > { %v2709_v58 = vadd.f32 %v5182_v18, %v2670_v42  ;;  %v3750_v45 = vpop.f32.mrb[24].mxu1  ;;  %v2740_v56 = vmax.f32 %v2708_v26, 0.0 }
 0x329   : > { %v2743_v52 = vmax.f32 %v2711_v59, 0.0  ;;  %v3844_v25 = vadd.f32 %v3750_v45, %v3654_v9  ;;  %v2531_v60 = vpop.f32.mrb[25].mxu1 }
 0x32a   : > { %v2741_v3 = vmax.f32 %v2709_v58, 0.0  ;;  %v3845_v28 = vadd.f32 %v2531_v60, %v5151_v17  ;;  %v3751_v13 = vpop.f32.mrb[26].mxu1 }
 0x32b   : > { %v2675_v57 = vmul.f32 %v3844_v25, %v5177_v63  ;;  %v3846_v6 = vadd.f32 %v3751_v13, %v5153_v54  ;;  %v2534_v46 = vpop.f32.mrb[27].mxu1  ;;  %v2771_v15 = vpack.c.bf16 %v2743_v52, %v2742_v19 }
 0x32c   : > { %v2673_v21 = vmul.f32 %v3845_v28, %v5177_v63  ;;  %v3847_v39 = vadd.f32 %v2534_v46, %v5155_v62  ;;  %v2770_v30 = vpack.c.bf16 %v2741_v3, %v2740_v56 }
 0x32d   : > { %v2714_v8 = vadd.f32 %v5182_v18, %v2675_v57  ;;  %v2676_v9 = vmul.f32 %v3846_v6, %v5177_v63 }
 0x32e   : > { %v2712_v14 = vadd.f32 %v5182_v18, %v2673_v21  ;;  %v2674_v17 = vmul.f32 %v3847_v39, %v5177_v63  ;;  %3792 = vmatprep.mubr.bf16.mxu0 %v2770_v30 }
 0x32f   : > { %v2715_v41 = vadd.f32 %v5182_v18, %v2676_v9  ;;  %3793 = vmatmul.mubr.bf16.gmra.mrb[52].mxu0 %v2771_v15  ;;  %v2746_v34 = vmax.f32 %v2714_v8, 0.0 }
 0x330   : > { %v2713_v54 = vadd.f32 %v5182_v18, %v2674_v17  ;;  %v3754_v1 = vpop.f32.mrb[28].mxu1  ;;  %v2744_v40 = vmax.f32 %v2712_v14, 0.0 }
 0x331   : > { %v2747_v29 = vmax.f32 %v2715_v41, 0.0  ;;  %v3848_v62 = vadd.f32 %v3754_v1, %v5163_v10  ;;  %v2547_v20 = vpop.f32.mrb[29].mxu1 }
 0x332   : > { %v2745_v37 = vmax.f32 %v2713_v54, 0.0  ;;  %v3849_v2 = vadd.f32 %v2547_v20, %v5168_v31  ;;  %v3755_v16 = vpop.f32.mrb[30].mxu1 }
 0x333   : > { %v2679_v22 = vmul.f32 %v3848_v62, %v5177_v63  ;;  %v3850_v38 = vadd.f32 %v3755_v16, %v5170_v50  ;;  %v2550_v32 = vpop.f32.mrb[31].mxu1  ;;  %v2773_v43 = vpack.c.bf16 %v2747_v29, %v2746_v34 }
 0x334   : > { %v2677_v7 = vmul.f32 %v3849_v2, %v5177_v63  ;;  %v3851_v4 = vadd.f32 %v2550_v32, %v5172_v48  ;;  %v2772_v11 = vpack.c.bf16 %v2745_v37, %v2744_v40 }
 0x335   : > { %v2718_v49 = vadd.f32 %v5182_v18, %v2679_v22  ;;  %v2680_v10 = vmul.f32 %v3850_v38, %v5177_v63 }
 0x336   : > { %v2716_v53 = vadd.f32 %v5182_v18, %v2677_v7  ;;  %v2678_v31 = vmul.f32 %v3851_v4, %v5177_v63  ;;  %3796 = vmatprep.mubr.bf16.mxu0 %v2772_v11 }
 0x337   : > { %v2719_v47 = vadd.f32 %v5182_v18, %v2680_v10  ;;  %3797 = vmatmul.mubr.bf16.gmra.mrb[56].mxu0 %v2773_v43  ;;  %v2750_v36 = vmax.f32 %v2718_v49, 0.0 }
 0x338   : > { %v2717_v50 = vadd.f32 %v5182_v18, %v2678_v31  ;;  %v3758_v61 = vpop.f32.mrb[0].mxu1  ;;  %v2748_v0 = vmax.f32 %v2716_v53, 0.0 }
 0x339   : > { %v2751_v5 = vmax.f32 %v2719_v47, 0.0  ;;  %v2683_v48 = vmul.f32 %v3758_v61, %v5177_v63  ;;  %v2563_v55 = vpop.f32.mrb[1].mxu1 }
 0x33a   : > { %v2749_v23 = vmax.f32 %v2717_v50, 0.0  ;;  %v2681_v35 = vmul.f32 %v5177_v63, %v2563_v55  ;;  %v3759_v12 = vpop.f32.mrb[2].mxu1 }
 0x33b   : > { %v2722_v27 = vadd.f32 %v5182_v18, %v2683_v48  ;;  %v2684_v44 = vmul.f32 %v3759_v12, %v5177_v63  ;;  %v2566_v33 = vpop.f32.mrb[3].mxu1  ;;  %v2775_v51 = vpack.c.bf16 %v2751_v5, %v2750_v36 }
 0x33c   : > { %v2720_v24 = vadd.f32 %v5182_v18, %v2681_v35  ;;  %v2682_v26 = vmul.f32 %v5177_v63, %v2566_v33  ;;  %v2774_v42 = vpack.c.bf16 %v2749_v23, %v2748_v0 }
 0x33d   : > { %v2723_v59 = vadd.f32 %v5182_v18, %v2684_v44  ;;  %v2754_v45 = vmax.f32 %v2722_v27, 0.0 }
 0x33e   : > { %v2721_v58 = vadd.f32 %v5182_v18, %v2682_v26  ;;  %3800 = vmatprep.mubr.bf16.mxu0 %v2774_v42  ;;  %v2752_v52 = vmax.f32 %v2720_v24, 0.0 }
 0x33f   : > { %v2755_v19 = vmax.f32 %v2723_v59, 0.0  ;;  %3801 = vmatmul.mubr.bf16.gmra.mrb[60].mxu0 %v2775_v51  ;;  %v5258_v59 = vld [vmem:[%s5414_s8] ss:$0 sm:$0xff] }
 0x340   : > { %v2753_v25 = vmax.f32 %v2721_v58, 0.0  ;;  %v3762_v60 = vpop.f32.mrb[4].mxu1  ;;  %v5263_v58 = vld [vmem:[%s5415_s9] ss:$0 sm:$0xff] }
 0x341   : > { %v2687_v56 = vmul.f32 %v3762_v60, %v5177_v63  ;;  %v2579_v3 = vpop.f32.mrb[5].mxu1  ;;  %v2777_v28 = vpack.c.bf16 %v2755_v19, %v2754_v45 }
 0x342   : > { %v2685_v13 = vmul.f32 %v5177_v63, %v2579_v3  ;;  %v3763_v57 = vpop.f32.mrb[6].mxu1  ;;  %v2776_v6 = vpack.c.bf16 %v2753_v25, %v2752_v52 }
 0x343   : > { %v2726_v46 = vadd.f32 %v5182_v18, %v2687_v56  ;;  %v2688_v15 = vmul.f32 %v3763_v57, %v5177_v63  ;;  %v2582_v21 = vpop.f32.mrb[7].mxu1 }
 0x344   : > { %v2724_v39 = vadd.f32 %v5182_v18, %v2685_v13  ;;  %v2686_v30 = vmul.f32 %v5177_v63, %v2582_v21  ;;  %3804 = vmatprep.mubr.bf16.mxu0 %v2776_v6 }
 0x345   : > { %v2727_v8 = vadd.f32 %v5182_v18, %v2688_v15  ;;  %v2758_v14 = vmax.f32 %v2726_v46, 0.0 }
 0x346   : > { %v2725_v9 = vadd.f32 %v5182_v18, %v2686_v30  ;;  %v2756_v41 = vmax.f32 %v2724_v39, 0.0 }
 0x347   : > { %v2759_v17 = vmax.f32 %v2727_v8, 0.0  ;;  %3805 = vmatmul.mubr.bf16.gmra.mrb[64].mxu0 %v2777_v28 }
 0x348   : > { %v2757_v54 = vmax.f32 %v2725_v9, 0.0  ;;  %v3766_v1 = vpop.f32.mrb[8].mxu1 }
 0x349   : > { %v2691_v34 = vmul.f32 %v3766_v1, %v5177_v63  ;;  %v2595_v29 = vpop.f32.mrb[9].mxu1  ;;  %v2779_v62 = vpack.c.bf16 %v2759_v17, %v2758_v14 }
 0x34a   : > { %v2689_v20 = vmul.f32 %v5177_v63, %v2595_v29  ;;  %v3767_v40 = vpop.f32.mrb[10].mxu1  ;;  %v2778_v37 = vpack.c.bf16 %v2757_v54, %v2756_v41 }
 0x34b   : > { %v2730_v2 = vadd.f32 %v5182_v18, %v2691_v34  ;;  %v2692_v16 = vmul.f32 %v3767_v40, %v5177_v63  ;;  %v2598_v22 = vpop.f32.mrb[11].mxu1 }
 0x34c   : > { %v2728_v38 = vadd.f32 %v5182_v18, %v2689_v20  ;;  %v2690_v32 = vmul.f32 %v5177_v63, %v2598_v22  ;;  %3808 = vmatprep.mubr.bf16.mxu0 %v2778_v37 }
 0x34d   : > { %v2731_v43 = vadd.f32 %v5182_v18, %v2692_v16  ;;  %v2762_v4 = vmax.f32 %v2730_v2, 0.0 }
 0x34e   : > { %v2729_v7 = vadd.f32 %v5182_v18, %v2690_v32  ;;  %v2760_v49 = vmax.f32 %v2728_v38, 0.0 }
 0x34f   : > { %v2763_v11 = vmax.f32 %v2731_v43, 0.0  ;;  %3809 = vmatmul.mubr.bf16.gmra.mrb[68].mxu0 %v2779_v62 }
 0x350   : > { %v2761_v10 = vmax.f32 %v2729_v7, 0.0  ;;  %v3770_v53 = vpop.f32.mrb[12].mxu1 }
 0x351   : > { %v2695_v31 = vmul.f32 %v3770_v53, %v5177_v63  ;;  %v2611_v47 = vpop.f32.mrb[13].mxu1  ;;  %v2781_v50 = vpack.c.bf16 %v2763_v11, %v2762_v4 }
 0x352   : > { %v2693_v61 = vmul.f32 %v5177_v63, %v2611_v47  ;;  %v3771_v36 = vpop.f32.mrb[14].mxu1  ;;  %v2780_v5 = vpack.c.bf16 %v2761_v10, %v2760_v49 }
 0x353   : > { %v2734_v48 = vadd.f32 %v5182_v18, %v2695_v31  ;;  %v2696_v55 = vmul.f32 %v3771_v36, %v5177_v63  ;;  %v2614_v0 = vpop.f32.mrb[15].mxu1 }
 0x354   : > { %v2732_v23 = vadd.f32 %v5182_v18, %v2693_v61  ;;  %v2694_v35 = vmul.f32 %v5177_v63, %v2614_v0  ;;  %3812 = vmatprep.mubr.bf16.mxu0 %v2780_v5 }
 0x355   : > { %v2735_v12 = vadd.f32 %v5182_v18, %v2696_v55  ;;  %v2766_v44 = vmax.f32 %v2734_v48, 0.0 }
 0x356   : > { %v2733_v27 = vadd.f32 %v5182_v18, %v2694_v35  ;;  %v2764_v51 = vmax.f32 %v2732_v23, 0.0 }
 0x357   : > { %v2767_v33 = vmax.f32 %v2735_v12, 0.0  ;;  %3813 = vmatmul.mubr.bf16.gmra.mrb[72].mxu0 %v2781_v50 }
 0x358   : > { %v2765_v24 = vmax.f32 %v2733_v27, 0.0 }
 0x359   : > { %v2783_v26 = vpack.c.bf16 %v2767_v33, %v2766_v44 }
 0x35a   : > { %v2782_v42 = vpack.c.bf16 %v2765_v24, %v2764_v51 }
 0x35c   : > { %3816 = vmatprep.mubr.bf16.mxu0 %v2782_v42 }
 0x35f   : > { %3817 = vmatmul.mubr.bf16.gmra.mrb[76].mxu0 %v2783_v26 }
 0x3fa   : > { %v3790_v63 = vpop.f32.mrb[48].mxu0 }
 0x3fb   : > { %v2882_v18 = vpop.f32.mrb[49].mxu0  ;;  %v3018_v56 = vmul.f32 %v3790_v63, %v5258_v59 }
 0x3fc   : > { %v3016_v45 = vmul.f32 %v5258_v59, %v2882_v18  ;;  %v3791_v19 = vpop.f32.mrb[50].mxu0 }
 0x3fd   : > { %v2885_v52 = vpop.f32.mrb[51].mxu0  ;;  %v3057_v46 = vadd.f32 %v5263_v58, %v3018_v56  ;;  %v3019_v15 = vmul.f32 %v3791_v19, %v5258_v59 }
 0x3fe   : > { %v3017_v25 = vmul.f32 %v5258_v59, %v2885_v52  ;;  %v3055_v60 = vadd.f32 %v5263_v58, %v3016_v45 }
 0x3ff   : > { %v3058_v21 = vadd.f32 %v5263_v58, %v3019_v15 }
 0x400   : > { %3087 = vxpose.xlu0.b32.start [1/16] %v3055_v60, 128  ;;  %v3056_v3 = vadd.f32 %v5263_v58, %v3017_v25 }
 0x402   : > { %v3794_v28 = vpop.f32.mrb[52].mxu0 }
 0x403   : > { %v2898_v13 = vpop.f32.mrb[53].mxu0  ;;  %v3022_v54 = vmul.f32 %v3794_v28, %v5258_v59 }
 0x404   : > { %3088 = vxpose.xlu0.b32.cont [2/16] %v3056_v3, 128  ;;  %v3795_v57 = vpop.f32.mrb[54].mxu0  ;;  %v3020_v39 = vmul.f32 %v5258_v59, %v2898_v13 }
 0x405   : > { %v2901_v6 = vpop.f32.mrb[55].mxu0  ;;  %v3061_v40 = vadd.f32 %v5263_v58, %v3022_v54  ;;  %v3023_v37 = vmul.f32 %v3795_v57, %v5258_v59 }
 0x406   : > { %v3059_v17 = vadd.f32 %v5263_v58, %v3020_v39  ;;  %v3021_v41 = vmul.f32 %v5258_v59, %v2901_v6 }
 0x407   : > { %v3062_v2 = vadd.f32 %v5263_v58, %v3023_v37 }
 0x408   : > { %3089 = vxpose.xlu0.b32.cont [3/16] %v3057_v46, 128  ;;  %v3060_v1 = vadd.f32 %v5263_v58, %v3021_v41 }
 0x40a   : > { %v3798_v30 = vpop.f32.mrb[56].mxu0 }
 0x40b   : > { %v2914_v8 = vpop.f32.mrb[57].mxu0  ;;  %v3026_v53 = vmul.f32 %v3798_v30, %v5258_v59 }
 0x40c   : > { %3090 = vxpose.xlu0.b32.cont [4/16] %v3058_v21, 128  ;;  %v3799_v9 = vpop.f32.mrb[58].mxu0  ;;  %v3024_v16 = vmul.f32 %v5258_v59, %v2914_v8 }
 0x40d   : > { %v2917_v14 = vpop.f32.mrb[59].mxu0  ;;  %v3065_v55 = vadd.f32 %v5263_v58, %v3026_v53  ;;  %v3027_v0 = vmul.f32 %v3799_v9, %v5258_v59 }
 0x40e   : > { %v3063_v4 = vadd.f32 %v5263_v58, %v3024_v16  ;;  %v3025_v11 = vmul.f32 %v5258_v59, %v2917_v14 }
 0x40f   : > { %v3066_v27 = vadd.f32 %v5263_v58, %v3027_v0  ;;  %v3161_v0 = vld [vmem:[%s4041_s24 + $0x50] sm:$0xff] }
 0x410   : > { %3091 = vxpose.xlu0.b32.cont [5/16] %v3059_v17, 128  ;;  %v3064_v31 = vadd.f32 %v5263_v58, %v3025_v11  ;;  %v3155_v11 = vld [vmem:[%s4041_s24 + $0x20] sm:$0xff] }
 0x412   : > { %v3802_v34 = vpop.f32.mrb[60].mxu0 }
 0x413   : > { %v2930_v29 = vpop.f32.mrb[61].mxu0  ;;  %v3030_v6 = vmul.f32 %v3802_v34, %v5258_v59 }
 0x414   : > { %3092 = vxpose.xlu0.b32.cont [6/16] %v3060_v1, 128  ;;  %v5278_v62 = vpop.f32.mrb[62].mxu0  ;;  %v3028_v12 = vmul.f32 %v5258_v59, %v2930_v29 }
 0x415   : > { %v2933_v20 = vpop.f32.mrb[63].mxu0  ;;  %v3069_v17 = vadd.f32 %v5263_v58, %v3030_v6  ;;  %v3031_v41 = vmul.f32 %v5278_v62, %v5258_v59 }
 0x416   : > { %v3067_v18 = vadd.f32 %v5263_v58, %v3028_v12  ;;  %v3029_v45 = vmul.f32 %v5258_v59, %v2933_v20 }
 0x417   : > { %v3070_v62 = vadd.f32 %v5263_v58, %v3031_v41 }
 0x418   : > { %3093 = vxpose.xlu0.b32.cont [7/16] %v3061_v40, 128  ;;  %v3068_v46 = vadd.f32 %v5263_v58, %v3029_v45  ;;  %v3167_v45 = vld [vmem:[%s4041_s24 + $0x80] sm:$0xff] }
 0x41a   : > { %v3806_v22 = vpop.f32.mrb[64].mxu0 }
 0x41b   : > { %v2946_v38 = vpop.f32.mrb[65].mxu0  ;;  %v3034_v47 = vmul.f32 %v3806_v22, %v5258_v59 }
 0x41c   : > { %v3032_v32 = vmul.f32 %v5258_v59, %v2946_v38  ;;  %3094 = vxpose.xlu0.b32.cont [8/16] %v3062_v2, 128  ;;  %v3807_v43 = vpop.f32.mrb[66].mxu0 }
 0x41d   : > { %v2949_v7 = vpop.f32.mrb[67].mxu0  ;;  %v3073_v23 = vadd.f32 %v5263_v58, %v3034_v47  ;;  %v3035_v35 = vmul.f32 %v3807_v43, %v5258_v59 }
 0x41e   : > { %v3033_v49 = vmul.f32 %v5258_v59, %v2949_v7  ;;  %v3071_v10 = vadd.f32 %v5263_v58, %v3032_v32 }
 0x41f   : > { %v3074_v44 = vadd.f32 %v5263_v58, %v3035_v35 }
 0x420   : > { %3095 = vxpose.xlu0.b32.cont [9/16] %v3063_v4, 128  ;;  %3119 = vxpose.xlu1.b32.start [1/16] %v3071_v10, 128  ;;  %v3072_v50 = vadd.f32 %v5263_v58, %v3033_v49 }
 0x422   : > { %v3810_v61 = vpop.f32.mrb[68].mxu0 }
 0x423   : > { %v2962_v36 = vpop.f32.mrb[69].mxu0  ;;  %v3038_v15 = vmul.f32 %v3810_v61, %v5258_v59 }
 0x424   : > { %3096 = vxpose.xlu0.b32.cont [10/16] %v3064_v31, 128  ;;  %3120 = vxpose.xlu1.b32.cont [2/16] %v3072_v50, 128  ;;  %v3811_v5 = vpop.f32.mrb[70].mxu0  ;;  %v3036_v33 = vmul.f32 %v5258_v59, %v2962_v36  ;;  %v3157_v31 = vld [vmem:[%s4041_s24 + $0x30] sm:$0xff]  ;;  %v3159_v36 = vld [vmem:[%s4041_s24 + $0x40] sm:$0xff] }
 0x425   : > { %v2965_v48 = vpop.f32.mrb[71].mxu0  ;;  %v3077_v29 = vadd.f32 %v5263_v58, %v3038_v15  ;;  %v3039_v20 = vmul.f32 %v3811_v5, %v5258_v59 }
 0x426   : > { %v3075_v60 = vadd.f32 %v5263_v58, %v3036_v33  ;;  %v3037_v56 = vmul.f32 %v5258_v59, %v2965_v48 }
 0x427   : > { %v3078_v22 = vadd.f32 %v5263_v58, %v3039_v20 }
 0x428   : > { %3097 = vxpose.xlu0.b32.cont [11/16] %v3065_v55, 128  ;;  %3121 = vxpose.xlu1.b32.cont [3/16] %v3073_v23, 128  ;;  %v3076_v21 = vadd.f32 %v5263_v58, %v3037_v56 }
 0x42a   : > { %v3814_v51 = vpop.f32.mrb[72].mxu0 }
 0x42b   : > { %v3042_v24 = vmul.f32 %v3814_v51, %v5258_v59  ;;  %v2978_v26 = vpop.f32.mrb[73].mxu0 }
 0x42c   : > { %v3040_v42 = vmul.f32 %v5258_v59, %v2978_v26  ;;  %3098 = vxpose.xlu0.b32.cont [12/16] %v3066_v27, 128  ;;  %3122 = vxpose.xlu1.b32.cont [4/16] %v3074_v44, 128  ;;  %v3815_v63 = vpop.f32.mrb[74].mxu0  ;;  %v3163_v27 = vld [vmem:[%s4041_s24 + $0x60] sm:$0xff] }
 0x42d   : > { %v3081_v19 = vadd.f32 %v5263_v58, %v3042_v24  ;;  %v3043_v52 = vmul.f32 %v3815_v63, %v5258_v59  ;;  %v2981_v25 = vpop.f32.mrb[75].mxu0  ;;  %v3165_v24 = vld [vmem:[%s4041_s24 + $0x70] sm:$0xff] }
 0x42e   : > { %v3079_v3 = vadd.f32 %v5263_v58, %v3040_v42  ;;  %v3041_v28 = vmul.f32 %v5258_v59, %v2981_v25 }
 0x42f   : > { %v3082_v13 = vadd.f32 %v5263_v58, %v3043_v52 }
 0x430   : > { %v3080_v57 = vadd.f32 %v5263_v58, %v3041_v28  ;;  %3099 = vxpose.xlu0.b32.cont [13/16] %v3067_v18, 128  ;;  %3123 = vxpose.xlu1.b32.cont [5/16] %v3075_v60, 128  ;;  %v3152_v18 = vld [vmem:[%s4041_s24 + $0x8] sm:$0xff]  ;;  %v3169_v28 = vld [vmem:[%s4041_s24 + $0x90] sm:$0xff] }
 0x432   : > { %v3818_v39 = vpop.f32.mrb[76].mxu0 }
 0x433   : > { %v3046_v30 = vmul.f32 %v3818_v39, %v5258_v59  ;;  %v2994_v8 = vpop.f32.mrb[77].mxu0  ;;  %v3156_v39 = vld [vmem:[%s4041_s24 + $0x28] sm:$0xff] }
 0x434   : > { %v3044_v9 = vmul.f32 %v5258_v59, %v2994_v8  ;;  %3100 = vxpose.xlu0.b32.cont [14/16] %v3068_v46, 128  ;;  %3124 = vxpose.xlu1.b32.cont [6/16] %v3076_v21, 128  ;;  %v3819_v14 = vpop.f32.mrb[78].mxu0 }
 0x435   : > { %v3085_v54 = vadd.f32 %v5263_v58, %v3046_v30  ;;  %v3047_v1 = vmul.f32 %v3819_v14, %v5258_v59  ;;  %v2997_v34 = vpop.f32.mrb[79].mxu0  ;;  %v3171_v30 = vld [vmem:[%s4041_s24 + $0xa0] sm:$0xff] }
 0x436   : > { %v3083_v40 = vadd.f32 %v5263_v58, %v3044_v9  ;;  %v3045_v37 = vmul.f32 %v5258_v59, %v2997_v34  ;;  %v3151_v59 = vld [vmem:[%s4041_s24] sm:$0xff]  ;;  %v3173_v34 = vld [vmem:[%s4041_s24 + $0xb0] sm:$0xff] }
 0x437   : > { %v3086_v2 = vadd.f32 %v5263_v58, %v3047_v1  ;;  %v3158_v1 = vld [vmem:[%s4041_s24 + $0x38] sm:$0xff] }
 0x438   : > { %v3084_v16 = vadd.f32 %v5263_v58, %v3045_v37  ;;  %3101 = vxpose.xlu0.b32.cont [15/16] %v3069_v17, 128  ;;  %3125 = vxpose.xlu1.b32.cont [7/16] %v3077_v29, 128  ;;  %v3153_v58 = vld [vmem:[%s4041_s24 + $0x10] sm:$0xff] }
 0x43c   : > { %3102 = vxpose.xlu0.b32.end [16/16] %v3070_v62, 128  ;;  %3126 = vxpose.xlu1.b32.cont [8/16] %v3078_v22, 128  ;;  %v3160_v62 = vld [vmem:[%s4041_s24 + $0x48] sm:$0xff]  ;;  %v3175_v22 = vld [vmem:[%s4041_s24 + $0xc0] sm:$0xff] }
 0x440   : > { %3127 = vxpose.xlu1.b32.cont [9/16] %v3079_v3, 128  ;;  %v3154_v3 = vld [vmem:[%s4041_s24 + $0x18] sm:$0xff] }
 0x444   : > { %3128 = vxpose.xlu1.b32.cont [10/16] %v3080_v57, 128 }
 0x448   : > { %3129 = vxpose.xlu1.b32.cont [11/16] %v3081_v19, 128 }
 0x44c   : > { %3130 = vxpose.xlu1.b32.cont [12/16] %v3082_v13, 128 }
 0x450   : > { %3131 = vxpose.xlu1.b32.cont [13/16] %v3083_v40, 128 }
 0x454   : > { %3132 = vxpose.xlu1.b32.cont [14/16] %v3084_v16, 128 }
 0x458   : > { %3133 = vxpose.xlu1.b32.cont [15/16] %v3085_v54, 128 }
 0x45c   : > { %3134 = vxpose.xlu1.b32.end [16/16] %v3086_v2, 128 }
 0x480   : > { %v3103_v38 = vpop.trf.xlu0 }
 0x481   : > { %v3183_v32 = vadd.f32 %v3151_v59, %v3103_v38 }
 0x483   : > { %v3215_v43 = vmax.f32 %v3183_v32, 0.0 }
 0x484   : > { %v3104_v7 = vpop.trf.xlu0 }
 0x485   : > { %3247 = vst [vmem:[%s5338_s17] sm:$0xff] %v3215_v43  ;;  %v3185_v4 = vadd.f32 %v3153_v58, %v3104_v7 }
 0x487   : > { %v3217_v49 = vmax.f32 %v3185_v4, 0.0  ;;  %v3162_v4 = vld [vmem:[%s4041_s24 + $0x58] sm:$0xff] }
 0x488   : > { %v3105_v10 = vpop.trf.xlu0 }
 0x489   : > { %3249 = vst [vmem:[%s5338_s17 + $0x10] sm:$0xff] %v3217_v49  ;;  %v3187_v53 = vadd.f32 %v3155_v11, %v3105_v10  ;;  %v3177_v11 = vld [vmem:[%s4041_s24 + $0xd0] sm:$0xff] }
 0x48b   : > { %v3219_v47 = vmax.f32 %v3187_v53, 0.0 }
 0x48c   : > { %v3106_v50 = vpop.trf.xlu0 }
 0x48d   : > { %3251 = vst [vmem:[%s5338_s17 + $0x20] sm:$0xff] %v3219_v47  ;;  %v3189_v61 = vadd.f32 %v3157_v31, %v3106_v50 }
 0x48f   : > { %v3221_v5 = vmax.f32 %v3189_v61, 0.0  ;;  %v3164_v61 = vld [vmem:[%s4041_s24 + $0x68] sm:$0xff] }
 0x490   : > { %v3107_v48 = vpop.trf.xlu0 }
 0x491   : > { %3253 = vst [vmem:[%s5338_s17 + $0x30] sm:$0xff] %v3221_v5  ;;  %v3191_v55 = vadd.f32 %v3159_v36, %v3107_v48  ;;  %v3179_v36 = vld [vmem:[%s4041_s24 + $0xe0] sm:$0xff] }
 0x493   : > { %v3223_v23 = vmax.f32 %v3191_v55, 0.0 }
 0x494   : > { %v3108_v35 = vpop.trf.xlu0 }
 0x495   : > { %3255 = vst [vmem:[%s5338_s17 + $0x40] sm:$0xff] %v3223_v23  ;;  %v3193_v12 = vadd.f32 %v3161_v0, %v3108_v35 }
 0x497   : > { %v3225_v44 = vmax.f32 %v3193_v12, 0.0  ;;  %v3166_v12 = vld [vmem:[%s4041_s24 + $0x78] sm:$0xff] }
 0x498   : > { %v3109_v33 = vpop.trf.xlu0 }
 0x499   : > { %3257 = vst [vmem:[%s5338_s17 + $0x50] sm:$0xff] %v3225_v44  ;;  %v3195_v51 = vadd.f32 %v3163_v27, %v3109_v33  ;;  %v3181_v27 = vld [vmem:[%s4041_s24 + $0xf0] sm:$0xff] }
 0x49b   : > { %v3227_v26 = vmax.f32 %v3195_v51, 0.0 }
 0x49c   : > { %v3110_v42 = vpop.trf.xlu0 }
 0x49d   : > { %3259 = vst [vmem:[%s5338_s17 + $0x60] sm:$0xff] %v3227_v26  ;;  %v3197_v63 = vadd.f32 %v3165_v24, %v3110_v42 }
 0x49f   : > { %v3229_v19 = vmax.f32 %v3197_v63, 0.0  ;;  %v3168_v63 = vld [vmem:[%s4041_s24 + $0x88] sm:$0xff] }
 0x4a0   : > { %v3135_v52 = vpop.trf.xlu1  ;;  %v3111_v25 = vpop.trf.xlu0 }
 0x4a1   : > { %v3184_v60 = vadd.f32 %v3152_v18, %v3135_v52  ;;  %3261 = vst [vmem:[%s5338_s17 + $0x70] sm:$0xff] %v3229_v19  ;;  %v3199_v56 = vadd.f32 %v3167_v45, %v3111_v25  ;;  %v3170_v25 = vld [vmem:[%s4041_s24 + $0x98] sm:$0xff] }
 0x4a3   : > { %v3216_v13 = vmax.f32 %v3184_v60, 0.0  ;;  %v3231_v57 = vmax.f32 %v3199_v56, 0.0 }
 0x4a4   : > { %v3136_v6 = vpop.trf.xlu1  ;;  %v3112_v46 = vpop.trf.xlu0 }
 0x4a5   : > { %3248 = vst [vmem:[%s5338_s17 + $0x8] sm:$0xff] %v3216_v13  ;;  %v3186_v15 = vadd.f32 %v3154_v3, %v3136_v6  ;;  %3263 = vst [vmem:[%s5338_s17 + $0x80] sm:$0xff] %v3231_v57  ;;  %v3201_v21 = vadd.f32 %v3169_v28, %v3112_v46  ;;  %v3172_v28 = vld [vmem:[%s4041_s24 + $0xa8] sm:$0xff]  ;;  %v3174_v46 = vld [vmem:[%s4041_s24 + $0xb8] sm:$0xff] }
 0x4a7   : > { %v3218_v8 = vmax.f32 %v3186_v15, 0.0  ;;  %v3233_v9 = vmax.f32 %v3201_v21, 0.0 }
 0x4a8   : > { %v3137_v14 = vpop.trf.xlu1  ;;  %v3113_v17 = vpop.trf.xlu0 }
 0x4a9   : > { %3250 = vst [vmem:[%s5338_s17 + $0x18] sm:$0xff] %v3218_v8  ;;  %v3188_v41 = vadd.f32 %v3156_v39, %v3137_v14  ;;  %3265 = vst [vmem:[%s5338_s17 + $0x90] sm:$0xff] %v3233_v9  ;;  %v3203_v54 = vadd.f32 %v3171_v30, %v3113_v17  ;;  %v3176_v30 = vld [vmem:[%s4041_s24 + $0xc8] sm:$0xff]  ;;  %v3178_v17 = vld [vmem:[%s4041_s24 + $0xd8] sm:$0xff] }
 0x4ab   : > { %v3220_v29 = vmax.f32 %v3188_v41, 0.0  ;;  %v3235_v20 = vmax.f32 %v3203_v54, 0.0 }
 0x4ac   : > { %v3138_v40 = vpop.trf.xlu1  ;;  %v3114_v37 = vpop.trf.xlu0 }
 0x4ad   : > { %3252 = vst [vmem:[%s5338_s17 + $0x28] sm:$0xff] %v3220_v29  ;;  %v3190_v2 = vadd.f32 %v3158_v1, %v3138_v40  ;;  %3267 = vst [vmem:[%s5338_s17 + $0xa0] sm:$0xff] %v3235_v20  ;;  %v3205_v16 = vadd.f32 %v3173_v34, %v3114_v37  ;;  %v3180_v34 = vld [vmem:[%s4041_s24 + $0xe8] sm:$0xff]  ;;  %v3182_v37 = vld [vmem:[%s4041_s24 + $0xf8] sm:$0xff] }
 0x4af   : > { %v3222_v59 = vmax.f32 %v3190_v2, 0.0  ;;  %v3237_v38 = vmax.f32 %v3205_v16, 0.0 }
 0x4b0   : > { %v3139_v32 = vpop.trf.xlu1  ;;  %v3115_v58 = vpop.trf.xlu0 }
 0x4b1   : > { %3254 = vst [vmem:[%s5338_s17 + $0x38] sm:$0xff] %v3222_v59  ;;  %v3192_v43 = vadd.f32 %v3160_v62, %v3139_v32  ;;  %3269 = vst [vmem:[%s5338_s17 + $0xb0] sm:$0xff] %v3237_v38  ;;  %v3207_v7 = vadd.f32 %v3175_v22, %v3115_v58 }
 0x4b3   : > { %v3224_v49 = vmax.f32 %v3192_v43, 0.0  ;;  %v3239_v10 = vmax.f32 %v3207_v7, 0.0 }
 0x4b4   : > { %v3140_v53 = vpop.trf.xlu1  ;;  %v3116_v31 = vpop.trf.xlu0 }
 0x4b5   : > { %3256 = vst [vmem:[%s5338_s17 + $0x48] sm:$0xff] %v3224_v49  ;;  %v3194_v47 = vadd.f32 %v3162_v4, %v3140_v53  ;;  %3271 = vst [vmem:[%s5338_s17 + $0xc0] sm:$0xff] %v3239_v10  ;;  %v3209_v50 = vadd.f32 %v3177_v11, %v3116_v31 }
 0x4b7   : > { %v3226_v5 = vmax.f32 %v3194_v47, 0.0  ;;  %v3241_v48 = vmax.f32 %v3209_v50, 0.0 }
 0x4b8   : > { %v3141_v55 = vpop.trf.xlu1  ;;  %v3117_v0 = vpop.trf.xlu0 }
 0x4b9   : > { %3258 = vst [vmem:[%s5338_s17 + $0x58] sm:$0xff] %v3226_v5  ;;  %v3196_v23 = vadd.f32 %v3164_v61, %v3141_v55  ;;  %3273 = vst [vmem:[%s5338_s17 + $0xd0] sm:$0xff] %v3241_v48  ;;  %v3211_v35 = vadd.f32 %v3179_v36, %v3117_v0 }
 0x4bb   : > { %v3228_v44 = vmax.f32 %v3196_v23, 0.0  ;;  %v3243_v33 = vmax.f32 %v3211_v35, 0.0 }
 0x4bc   : > { %v3142_v51 = vpop.trf.xlu1  ;;  %v3118_v24 = vpop.trf.xlu0 }
 0x4bd   : > { %3260 = vst [vmem:[%s5338_s17 + $0x68] sm:$0xff] %v3228_v44  ;;  %v3198_v26 = vadd.f32 %v3166_v12, %v3142_v51  ;;  %3275 = vst [vmem:[%s5338_s17 + $0xe0] sm:$0xff] %v3243_v33  ;;  %v3213_v42 = vadd.f32 %v3181_v27, %v3118_v24 }
 0x4bf   : > { %v3230_v18 = vmax.f32 %v3198_v26, 0.0  ;;  %v3245_v45 = vmax.f32 %v3213_v42, 0.0 }
 0x4c0   : > { %v3143_v19 = vpop.trf.xlu1 }
 0x4c1   : > { %3262 = vst [vmem:[%s5338_s17 + $0x78] sm:$0xff] %v3230_v18  ;;  %v3200_v52 = vadd.f32 %v3168_v63, %v3143_v19  ;;  %3277 = vst [vmem:[%s5338_s17 + $0xf0] sm:$0xff] %v3245_v45 }
 0x4c3   : > { %v3232_v60 = vmax.f32 %v3200_v52, 0.0 }
 0x4c4   : > { %v3144_v56 = vpop.trf.xlu1 }
 0x4c5   : > { %3264 = vst [vmem:[%s5338_s17 + $0x88] sm:$0xff] %v3232_v60  ;;  %v3202_v3 = vadd.f32 %v3170_v25, %v3144_v56 }
 0x4c7   : > { %v3234_v13 = vmax.f32 %v3202_v3, 0.0 }
 0x4c8   : > { %v3145_v57 = vpop.trf.xlu1 }
 0x4c9   : > { %3266 = vst [vmem:[%s5338_s17 + $0x98] sm:$0xff] %v3234_v13  ;;  %v3204_v6 = vadd.f32 %v3172_v28, %v3145_v57 }
 0x4cb   : > { %v3236_v15 = vmax.f32 %v3204_v6, 0.0 }
 0x4cc   : > { %v3146_v21 = vpop.trf.xlu1 }
 0x4cd   : > { %3268 = vst [vmem:[%s5338_s17 + $0xa8] sm:$0xff] %v3236_v15  ;;  %v3206_v39 = vadd.f32 %v3174_v46, %v3146_v21 }
 0x4cf   : > { %v3238_v8 = vmax.f32 %v3206_v39, 0.0 }
 0x4d0   : > { %v3147_v9 = vpop.trf.xlu1 }
 0x4d1   : > { %3270 = vst [vmem:[%s5338_s17 + $0xb8] sm:$0xff] %v3238_v8  ;;  %v3208_v14 = vadd.f32 %v3176_v30, %v3147_v9 }
 0x4d3   : > { %v3240_v41 = vmax.f32 %v3208_v14, 0.0 }
 0x4d4   : > { %v3148_v54 = vpop.trf.xlu1 }
 0x4d5   : > { %3272 = vst [vmem:[%s5338_s17 + $0xc8] sm:$0xff] %v3240_v41  ;;  %v3210_v1 = vadd.f32 %v3178_v17, %v3148_v54 }
 0x4d7   : > { %v3242_v29 = vmax.f32 %v3210_v1, 0.0 }
 0x4d8   : > { %v3149_v20 = vpop.trf.xlu1 }
 0x4d9   : > { %3274 = vst [vmem:[%s5338_s17 + $0xd8] sm:$0xff] %v3242_v29  ;;  %v3212_v40 = vadd.f32 %v3180_v34, %v3149_v20 }
 0x4db   : > { %v3244_v2 = vmax.f32 %v3212_v40, 0.0 }
 0x4dc   : > { %v3150_v16 = vpop.trf.xlu1 }
 0x4dd   : > { %3276 = vst [vmem:[%s5338_s17 + $0xe8] sm:$0xff] %v3244_v2  ;;  %v3214_v62 = vadd.f32 %v3182_v37, %v3150_v16 }
 0x4df   : > { %v3246_v22 = vmax.f32 %v3214_v62, 0.0 }
 0x4e1   : > { %3278 = vst [vmem:[%s5338_s17 + $0xf8] sm:$0xff] %v3246_v22 }
 0x4e2 PF: > { %s20_s13 = sadd.s32 1, %s3957_s13  }
 0x4e3   : > { %p17_p4 = scmp.ge.s32.totalorder %s20_s13, 4  }
 0x4e5   :  { %19 = sbr.rel (!%p17_p4) target bundleno = 1 (0x1), region = 92 }

</bundles_post_ra>
